<compile_context>
chip_gen: v7x
topology: tpu7x:2x2x1
jax: 0.10.0
libtpu: 0.0.40
codegen_flags: <defaults>
</compile_context>

<pallas_src>
import functools

import jax
import jax.numpy as jnp
from jax import lax
from jax.experimental import pallas as pl
from jax.experimental.pallas import tpu as pltpu

# ----- synthetic config (mirrors cfg.GAN.Z_DIM / cfg.TREE.BASE_SIZE, small) -----
Z_DIM = 32
BASE_SIZE = 32            # height = width = BASE_SIZE // 8 = 4
NGF = 16                  # gf_dim
BN_EPS = 1e-5

# ----- derived geometry -----
H0 = W0 = BASE_SIZE // 8        # 4   : fc output spatial
C1 = NGF                        # 16  : fc output channels
C2 = NGF // 2                   # 8   : upBlock1 output channels
C3 = NGF // 4                   # 4   : upBlock2 output channels
H1, W1 = 2 * H0, 2 * W0         # 8   : upBlock1 output spatial
H2, W2 = 2 * H1, 2 * W1         # 16  : upBlock2 output spatial
HP1 = H1 + 2                    # 10  : H-halo-padded conv1 input rows
H2P = H2 // 2                   # 8   : conv2 output H row-pairs
RW1 = W1 * C1                   # 128 : lanes of one W-upsampled stage-1 row (w1, c1)
RW2 = W2 * C2                   # 128 : lanes of one W-upsampled conv1 row (w2, c2)
N_FC = 2 * H0 * RW1             # 1024: fused fc columns   [value | gate]
N_C1 = 2 * RW2                  # 256 : fused conv1 columns [value | gate]
N_C2 = 4 * W2 * C3              # 256 : fused conv2 columns [ev_val|od_val|ev_gate|od_gate]
OUT_LANES = 2 * W2 * C3         # 128 : lanes of one stored output row-pair


def _sigmoid(x):
    # keep the divide on the EUP slot (vrcp), parallel to MXU/VPU work
    return pl.reciprocal(1.0 + jnp.exp(-x), approx=True)


# ------------------------------ the fused kernel ------------------------------
def fused_kernel(z_ref, fcw_ref, fcb_ref, m1_ref, b1_ref, m2_ref, b2_ref,
                 o_ref, pad1_ref, p2e_ref, p2o_ref):
    tb = z_ref.shape[0]

    # zero ONLY the H-halo rows; interior rows are fully overwritten every step
    zero1 = jnp.zeros((tb, RW1), jnp.bfloat16)
    pad1_ref[0] = zero1
    pad1_ref[HP1 - 1] = zero1
    zero2 = jnp.zeros((tb, RW2), jnp.bfloat16)
    p2e_ref[0] = zero2          # padded row 0
    p2o_ref[H2P] = zero2        # padded row 2*H2 + 1

    # ---- stage 1: fc (BN1d folded, value||gate fused along N) + GLU ----
    zb = z_ref[...].astype(jnp.bfloat16)
    h = jnp.dot(zb, fcw_ref[...], preferred_element_type=jnp.float32) + fcb_ref[...]
    half = H0 * RW1
    h1 = (h[:, :half] * _sigmoid(h[:, half:])).astype(jnp.bfloat16)   # (tb, 512)

    # nearest-2x H upsample: two aligned 128-lane stores per source row
    for i in range(H0):
        row = h1[:, i * RW1:(i + 1) * RW1]                            # (tb, 128)
        pad1_ref[1 + 2 * i] = row
        pad1_ref[2 + 2 * i] = row

    # ---- upBlock1: conv3x3 + BN2d + GLU (2x W-upsample folded into the columns) ----
    y1 = b1_ref[...]
    for kh in range(3):
        slab = pad1_ref[kh:kh + H1].reshape(H1 * tb, RW1)             # contiguous view
        y1 = y1 + jnp.dot(slab, m1_ref[kh], preferred_element_type=jnp.float32)
    h2 = (y1[:, :RW2] * _sigmoid(y1[:, RW2:])).astype(jnp.bfloat16)   # (H1*tb, 128)
    h2 = h2.reshape(H1, tb, RW2)

    # nearest-2x H upsample into the parity-split conv2 input scratch
    for i in range(H1):
        p2o_ref[i] = h2[i]          # padded row 2i + 1
        p2e_ref[i + 1] = h2[i]      # padded row 2i + 2

    # ---- upBlock2: conv3x3 + BN2d + GLU, two output H rows per matmul row ----
    y2 = b2_ref[...]
    slabs = (p2e_ref[0:H2P], p2o_ref[0:H2P], p2e_ref[1:H2P + 1], p2o_ref[1:H2P + 1])
    for t in range(4):
        slab = slabs[t].reshape(H2P * tb, RW2)
        y2 = y2 + jnp.dot(slab, m2_ref[t], preferred_element_type=jnp.float32)
    out = y2[:, :OUT_LANES] * _sigmoid(y2[:, OUT_LANES:])             # (H2P*tb, 128)
    o_ref[...] = out.reshape(H2P, tb, OUT_LANES)                      # lane-dense store


# --------------------------- parameter setup (deterministic) ---------------------------
def _bn_params(key, c):
    k0, k1, k2, k3 = jax.random.split(key, 4)
    return dict(
        gamma=1.0 + 0.2 * jax.random.normal(k0, (c,), jnp.float32),
        beta=0.1 * jax.random.normal(k1, (c,), jnp.float32),
        mean=0.1 * jax.random.normal(k2, (c,), jnp.float32),
        var=0.5 + jax.random.uniform(k3, (c,), jnp.float32),
    )


def init_raw_params(key):
    """PyTorch-layout parameters: Linear (out,in), Conv2d OIHW, BN running stats."""
    ks = jax.random.split(key, 6)
    fc_out = NGF * H0 * W0 * 2
    return dict(
        fc_w=0.05 * jax.random.normal(ks[0], (fc_out, Z_DIM), jnp.float32),
        fc_bn=_bn_params(ks[1], fc_out),
        c1_w=0.05 * jax.random.normal(ks[2], (2 * C2, C1, 3, 3), jnp.float32),
        c1_bn=_bn_params(ks[3], 2 * C2),
        c2_w=0.05 * jax.random.normal(ks[4], (2 * C3, C2, 3, 3), jnp.float32),
        c2_bn=_bn_params(ks[5], 2 * C3),
    )


def _fold_bn(bn):
    scale = bn["gamma"] / jnp.sqrt(bn["var"] + BN_EPS)
    shift = bn["beta"] - bn["mean"] * scale
    return scale, shift


def _fc_matrices(fc_w, bn):
    """Fold BN1d into fc; permute columns from NCHW-flat (c,h,w) to lane-flat (h, w1, c)
    with upBlock1's 2x W-upsample folded in; concatenate value||gate along N."""
    scale, shift = _fold_bn(bn)
    wf = fc_w.T * scale[None, :]                              # (nz, 2*C1*H0*W0)
    half = C1 * H0 * W0                                       # 256
    i = jnp.arange(H0)[:, None, None]
    ju = jnp.arange(W1)[None, :, None]                        # upsampled W coordinate
    c = jnp.arange(C1)[None, None, :]
    src = (c * (H0 * W0) + i * W0 + ju // 2).reshape(-1)      # (512,) -> (h, w1, c)
    w_fused = jnp.concatenate([wf[:, src], wf[:, half + src]], axis=1)
    b_fused = jnp.concatenate([shift[src], shift[half + src]])[None, :]
    return w_fused.astype(jnp.bfloat16), b_fused.astype(jnp.float32)


def _kw_band(w_kh, w_in, dup):
    """One kernel-row of a 3x3 conv as a banded matrix (w_in*cin, nq*cout).
    The W zero-padding is folded in (out-of-band taps dropped) and the next stage's
    2x W-upsample is optionally folded into duplicated output columns."""
    cout, cin, _ = w_kh.shape
    nq = 2 * w_in if dup else w_in
    jq = jnp.arange(nq)
    j = jq // 2 if dup else jq                                 # output spatial column
    wi = jnp.arange(w_in)                                      # input spatial column
    kw = wi[:, None] - j[None, :] + 1                          # (w_in, nq) tap index
    valid = ((kw >= 0) & (kw <= 2)).astype(jnp.float32)
    kwc = jnp.clip(kw, 0, 2)
    wt = jnp.transpose(w_kh, (2, 1, 0))                        # (3, cin, cout)
    g = wt[kwc] * valid[:, :, None, None]                      # (w_in, nq, cin, cout)
    return jnp.transpose(g, (0, 2, 1, 3)).reshape(w_in * cin, nq * cout)


def _conv1_matrices(conv_w, bn):
    """upBlock1 conv3x3 (+folded BN2d) as 3 kh-tap banded matrices; columns are
    [value (w2,c2) 128 | gate 128] with the next 2x W-upsample folded in."""
    scale, shift = _fold_bn(bn)
    wf = conv_w * scale[:, None, None, None]                   # (2*C2, C1, 3, 3)
    mats = []
    for kh in range(3):
        mv = _kw_band(wf[:C2, :, kh, :], W1, dup=True)         # (128, 128)
        mg = _kw_band(wf[C2:, :, kh, :], W1, dup=True)         # (128, 128)
        mats.append(jnp.concatenate([mv, mg], axis=1))         # (128, 256)
    m1 = jnp.stack(mats).astype(jnp.bfloat16)                  # (3, 128, 256)
    b1 = jnp.concatenate([jnp.tile(shift[:C2], W2), jnp.tile(shift[C2:], W2)])[None, :]
    return m1, b1.astype(jnp.float32)


def _conv2_matrices(conv_w, bn):
    """upBlock2 conv3x3 (+folded BN2d) as 4 banded matrices producing a PAIR of output
    H rows per matmul row: columns [even val 64 | odd val 64 | even gate | odd gate]."""
    scale, shift = _fold_bn(bn)
    wf = conv_w * scale[:, None, None, None]                   # (2*C3, C2, 3, 3)
    zeros = jnp.zeros((W2 * C2, W2 * C3), jnp.float32)

    def band(o_lo, kh):
        if kh < 0 or kh > 2:
            return zeros
        return _kw_band(wf[o_lo:o_lo + C3, :, kh, :], W2, dup=False)   # (128, 64)

    mats = []
    for t in range(4):          # tap t reads H-padded row 2*r + t for output pair r
        mats.append(jnp.concatenate(
            [band(0, t), band(0, t - 1), band(C3, t), band(C3, t - 1)], axis=1))
    m2 = jnp.stack(mats).astype(jnp.bfloat16)                  # (4, 128, 256)
    bv, bg = jnp.tile(shift[:C3], W2), jnp.tile(shift[C3:], W2)
    b2 = jnp.concatenate([bv, bv, bg, bg])[None, :]
    return m2, b2.astype(jnp.float32)


def prepare_params(raw):
    """One-time (outside jit): fold BN and repack all weights for the fused kernel."""
    fc_w, fc_b = _fc_matrices(raw["fc_w"], raw["fc_bn"])
    m1, b1 = _conv1_matrices(raw["c1_w"], raw["c1_bn"])
    m2, b2 = _conv2_matrices(raw["c2_w"], raw["c2_bn"])
    return dict(fc_w=fc_w, fc_b=fc_b, m1=m1, b1=b1, m2=m2, b2=b2)


# --------------------------------- full forward pass ---------------------------------
def _const_spec(shape):
    n = len(shape)
    return pl.BlockSpec(shape, lambda b: (0,) * n)


@functools.partial(jax.jit, static_argnames=("tb",))
def init_stage_g_pat_forward(z, kp, tb=256):
    B = z.shape[0]
    tb = min(tb, max(16, ((B + 15) // 16) * 16))      # keep TB a multiple of 16 (bf16)
    b_pad = ((B + tb - 1) // tb) * tb
    if b_pad != B:
        z = jnp.pad(z, ((0, b_pad - B), (0, 0)))
    grid = (b_pad // tb,)

    flops = 2 * b_pad * (Z_DIM * N_FC + 3 * H1 * RW1 * N_C1 + 4 * H2P * RW2 * N_C2)
    transc = b_pad * (H0 * RW1 + H1 * RW2 + H2P * OUT_LANES)
    bytes_acc = int(z.size) * 4 + b_pad * H2P * OUT_LANES * 4 + sum(
        int(v.size) * v.dtype.itemsize for v in kp.values())

    y = pl.pallas_call(
        fused_kernel,
        out_shape=jax.ShapeDtypeStruct((H2P, b_pad, OUT_LANES), jnp.float32),
        grid=grid,
        in_specs=[pl.BlockSpec((tb, Z_DIM), lambda b: (b, 0)),
                  _const_spec(kp["fc_w"].shape), _const_spec(kp["fc_b"].shape),
                  _const_spec(kp["m1"].shape), _const_spec(kp["b1"].shape),
                  _const_spec(kp["m2"].shape), _const_spec(kp["b2"].shape)],
        out_specs=pl.BlockSpec((H2P, tb, OUT_LANES), lambda b: (0, b, 0)),
        scratch_shapes=[pltpu.VMEM((HP1, tb, RW1), jnp.bfloat16),       # conv1 input rows
                        pltpu.VMEM((H2P + 1, tb, RW2), jnp.bfloat16),   # conv2 even rows
                        pltpu.VMEM((H2P + 1, tb, RW2), jnp.bfloat16)],  # conv2 odd rows
        compiler_params=pltpu.CompilerParams(
            dimension_semantics=("parallel",),
            vmem_limit_bytes=32 * 1024 * 1024),
        cost_estimate=pl.CostEstimate(flops=flops, transcendentals=transc,
                                      bytes_accessed=bytes_acc),
    )(z, kp["fc_w"], kp["fc_b"], kp["m1"], kp["b1"], kp["m2"], kp["b2"])

    # (row-pair, batch, [even|odd] x (w, c)) -> PyTorch NCHW (B, ngf//4, 4h, 4w).
    # NOTE: this transpose is a separate XLA pass over the output; drop it if the
    # consumer can take the lane-flat NHWC-style layout directly.
    y = y.reshape(H2P, b_pad, 2, W2, C3).transpose(1, 4, 0, 2, 3)
    return y.reshape(b_pad, C3, H2, W2)[:B]


# ----------------------------- pure-JAX f32 reference -----------------------------
def _bn_apply(x, bn, ch_axis):
    scale, shift = _fold_bn(bn)
    shape = [1] * x.ndim
    shape[ch_axis] = -1
    return x * scale.reshape(shape) + shift.reshape(shape)


def _glu(x, axis):
    c = x.shape[axis] // 2
    a = lax.slice_in_dim(x, 0, c, axis=axis)
    b = lax.slice_in_dim(x, c, 2 * c, axis=axis)
    return a * jax.nn.sigmoid(b)


def _up_block_ref(x, w, bn):
    x = jnp.repeat(jnp.repeat(x, 2, axis=2), 2, axis=3)               # nearest 2x
    y = lax.conv_general_dilated(x, w, (1, 1), "SAME",
                                 dimension_numbers=("NCHW", "OIHW", "NCHW"))
    return _glu(_bn_apply(y, bn, 1), 1)


def reference_forward(z, raw):
    x = z @ raw["fc_w"].T
    x = _glu(_bn_apply(x, raw["fc_bn"], 1), 1)
    x = x.reshape(z.shape[0], C1, H0, W0)
    x = _up_block_ref(x, raw["c1_w"], raw["c1_bn"])
    x = _up_block_ref(x, raw["c2_w"], raw["c2_bn"])
    return x


if __name__ == "__main__":
    key = jax.random.PRNGKey(0)
    kparam, kz = jax.random.split(key)
    raw = init_raw_params(kparam)
    kernel_params = prepare_params(raw)      # BN folding / repacking: once, outside jit

    z_code = jax.random.normal(kz, (2, Z_DIM), jnp.float32)
    out = init_stage_g_pat_forward(z_code, kernel_params)
    out = jax.block_until_ready(out)

    expected = (2, NGF // 4, 4 * H0, 4 * W0)         # (2, 4, 16, 16)
    assert out.shape == expected, (out.shape, expected)
    assert bool(jnp.all(jnp.isfinite(out)))

    ref = reference_forward(z_code, raw)
    max_err = float(jnp.max(jnp.abs(out - ref)))
    assert max_err < 5e-2, f"max abs error vs f32 reference: {max_err}"
    print("KERNEL_OK")
</pallas_src>

<mosaic_0001>
module attributes {stable_mosaic.version = 11 : i64} {
  func.func @fused_kernel(%arg0: i32, %arg1: memref<16x32xf32, #tpu.memory_space<vmem>>, %arg2: memref<32x1024xbf16, #tpu.memory_space<vmem>>, %arg3: memref<1x1024xf32, #tpu.memory_space<vmem>>, %arg4: memref<3x128x256xbf16, #tpu.memory_space<vmem>>, %arg5: memref<1x256xf32, #tpu.memory_space<vmem>>, %arg6: memref<4x128x256xbf16, #tpu.memory_space<vmem>>, %arg7: memref<1x256xf32, #tpu.memory_space<vmem>>, %arg8: memref<8x16x128xf32, #tpu.memory_space<vmem>>, %arg9: memref<10x16x128xbf16, #tpu.memory_space<vmem>>, %arg10: memref<9x16x128xbf16, #tpu.memory_space<vmem>>, %arg11: memref<9x16x128xbf16, #tpu.memory_space<vmem>>) attributes {dimension_semantics = [#tpu.dimension_semantics<parallel>], iteration_bounds = array<i64: 1>, scalar_prefetch = 0 : i64, scratch_operands = 3 : i64, tpu.core_type = #tpu.core_type<tc>, window_params = [{transform_indices = @transform_0, window_bounds = array<i64: 16, 32>}, {pipeline_mode = #tpu.pipeline_mode<synchronous>, transform_indices = @transform_1, window_bounds = array<i64: 32, 1024>}, {pipeline_mode = #tpu.pipeline_mode<synchronous>, transform_indices = @transform_2, window_bounds = array<i64: 1, 1024>}, {pipeline_mode = #tpu.pipeline_mode<synchronous>, transform_indices = @transform_3, window_bounds = array<i64: 3, 128, 256>}, {pipeline_mode = #tpu.pipeline_mode<synchronous>, transform_indices = @transform_4, window_bounds = array<i64: 1, 256>}, {pipeline_mode = #tpu.pipeline_mode<synchronous>, transform_indices = @transform_5, window_bounds = array<i64: 4, 128, 256>}, {pipeline_mode = #tpu.pipeline_mode<synchronous>, transform_indices = @transform_6, window_bounds = array<i64: 1, 256>}, {transform_indices = @transform_7, window_bounds = array<i64: 8, 16, 128>}]} {
    %cst = arith.constant 0.000000e+00 : bf16
    %0 = vector.broadcast %cst : bf16 to vector<16x128xbf16>
    %c0 = arith.constant 0 : index
    %c0_0 = arith.constant 0 : index
    %c0_1 = arith.constant 0 : index
    %1 = vector.load %arg9[%c0, %c0_0, %c0_1] : memref<10x16x128xbf16, #tpu.memory_space<vmem>>, vector<1x16x128xbf16>
    %2 = vector.shape_cast %1 : vector<1x16x128xbf16> to vector<16x128xbf16>
    %3 = vector.shape_cast %0 : vector<16x128xbf16> to vector<1x16x128xbf16>
    tpu.vector_store %arg9[%c0, %c0_0, %c0_1], %3 {strides = array<i32>} : memref<10x16x128xbf16, #tpu.memory_space<vmem>>, vector<1x16x128xbf16>,
    %c9 = arith.constant 9 : index
    %c0_2 = arith.constant 0 : index
    %c0_3 = arith.constant 0 : index
    %4 = vector.load %arg9[%c9, %c0_2, %c0_3] : memref<10x16x128xbf16, #tpu.memory_space<vmem>>, vector<1x16x128xbf16>
    %5 = vector.shape_cast %4 : vector<1x16x128xbf16> to vector<16x128xbf16>
    %6 = vector.shape_cast %0 : vector<16x128xbf16> to vector<1x16x128xbf16>
    tpu.vector_store %arg9[%c9, %c0_2, %c0_3], %6 {strides = array<i32>} : memref<10x16x128xbf16, #tpu.memory_space<vmem>>, vector<1x16x128xbf16>,
    %cst_4 = arith.constant 0.000000e+00 : bf16
    %7 = vector.broadcast %cst_4 : bf16 to vector<16x128xbf16>
    %c0_5 = arith.constant 0 : index
    %c0_6 = arith.constant 0 : index
    %c0_7 = arith.constant 0 : index
    %8 = vector.load %arg10[%c0_5, %c0_6, %c0_7] : memref<9x16x128xbf16, #tpu.memory_space<vmem>>, vector<1x16x128xbf16>
    %9 = vector.shape_cast %8 : vector<1x16x128xbf16> to vector<16x128xbf16>
    %10 = vector.shape_cast %7 : vector<16x128xbf16> to vector<1x16x128xbf16>
    tpu.vector_store %arg10[%c0_5, %c0_6, %c0_7], %10 {strides = array<i32>} : memref<9x16x128xbf16, #tpu.memory_space<vmem>>, vector<1x16x128xbf16>,
    %c8 = arith.constant 8 : index
    %c0_8 = arith.constant 0 : index
    %c0_9 = arith.constant 0 : index
    %11 = vector.load %arg11[%c8, %c0_8, %c0_9] : memref<9x16x128xbf16, #tpu.memory_space<vmem>>, vector<1x16x128xbf16>
    %12 = vector.shape_cast %11 : vector<1x16x128xbf16> to vector<16x128xbf16>
    %13 = vector.shape_cast %7 : vector<16x128xbf16> to vector<1x16x128xbf16>
    tpu.vector_store %arg11[%c8, %c0_8, %c0_9], %13 {strides = array<i32>} : memref<9x16x128xbf16, #tpu.memory_space<vmem>>, vector<1x16x128xbf16>,
    %c0_10 = arith.constant 0 : index
    %c0_11 = arith.constant 0 : index
    %14 = vector.load %arg1[%c0_10, %c0_11] : memref<16x32xf32, #tpu.memory_space<vmem>>, vector<16x32xf32>
    %15 = arith.truncf %14 : vector<16x32xf32> to vector<16x32xbf16>
    %c0_12 = arith.constant 0 : index
    %c0_13 = arith.constant 0 : index
    %16 = vector.load %arg2[%c0_12, %c0_13] : memref<32x1024xbf16, #tpu.memory_space<vmem>>, vector<32x1024xbf16>
    %cst_14 = arith.constant dense<0.000000e+00> : vector<16x1024xf32>
    %17 = tpu.matmul %15, %16, %cst_14 {dimension_numbers = #tpu.dot_dimension_numbers<[1], [0], [0], [1], [0, 0, 1, 1], [], []>} : vector<16x32xbf16>, vector<32x1024xbf16>, vector<16x1024xf32> -> vector<16x1024xf32>
    %c0_15 = arith.constant 0 : index
    %c0_16 = arith.constant 0 : index
    %18 = vector.load %arg3[%c0_15, %c0_16] : memref<1x1024xf32, #tpu.memory_space<vmem>>, vector<1x1024xf32>
    %19 = vector.broadcast %18 : vector<1x1024xf32> to vector<16x1024xf32>
    %20 = arith.addf %17, %19 : vector<16x1024xf32>
    %21 = vector.extract_strided_slice %20 {offsets = [0, 0], sizes = [16, 512], strides = [1, 1]} : vector<16x1024xf32> to vector<16x512xf32>
    %22 = vector.extract_strided_slice %20 {offsets = [0, 512], sizes = [16, 512], strides = [1, 1]} : vector<16x1024xf32> to vector<16x512xf32>
    %cst_17 = arith.constant 0.000000e+00 : f32
    %23 = vector.broadcast %cst_17 : f32 to vector<16x512xf32>
    %24 = arith.subf %23, %22 : vector<16x512xf32>
    %25 = math.exp %24 : vector<16x512xf32>
    %cst_18 = arith.constant 1.000000e+00 : f32
    %26 = vector.broadcast %cst_18 : f32 to vector<16x512xf32>
    %27 = arith.addf %26, %25 : vector<16x512xf32>
    %28 = tpu.reciprocal %27 {approx = true} : vector<16x512xf32> -> vector<16x512xf32>
    %29 = arith.mulf %21, %28 : vector<16x512xf32>
    %30 = arith.truncf %29 : vector<16x512xf32> to vector<16x512xbf16>
    %31 = vector.extract_strided_slice %30 {offsets = [0, 0], sizes = [16, 128], strides = [1, 1]} : vector<16x512xbf16> to vector<16x128xbf16>
    %c1 = arith.constant 1 : index
    %c0_19 = arith.constant 0 : index
    %c0_20 = arith.constant 0 : index
    %32 = vector.load %arg9[%c1, %c0_19, %c0_20] : memref<10x16x128xbf16, #tpu.memory_space<vmem>>, vector<1x16x128xbf16>
    %33 = vector.shape_cast %32 : vector<1x16x128xbf16> to vector<16x128xbf16>
    %34 = vector.shape_cast %31 : vector<16x128xbf16> to vector<1x16x128xbf16>
    tpu.vector_store %arg9[%c1, %c0_19, %c0_20], %34 {strides = array<i32>} : memref<10x16x128xbf16, #tpu.memory_space<vmem>>, vector<1x16x128xbf16>,
    %c2 = arith.constant 2 : index
    %c0_21 = arith.constant 0 : index
    %c0_22 = arith.constant 0 : index
    %35 = vector.load %arg9[%c2, %c0_21, %c0_22] : memref<10x16x128xbf16, #tpu.memory_space<vmem>>, vector<1x16x128xbf16>
    %36 = vector.shape_cast %35 : vector<1x16x128xbf16> to vector<16x128xbf16>
    %37 = vector.shape_cast %31 : vector<16x128xbf16> to vector<1x16x128xbf16>
    tpu.vector_store %arg9[%c2, %c0_21, %c0_22], %37 {strides = array<i32>} : memref<10x16x128xbf16, #tpu.memory_space<vmem>>, vector<1x16x128xbf16>,
    %38 = vector.extract_strided_slice %30 {offsets = [0, 128], sizes = [16, 128], strides = [1, 1]} : vector<16x512xbf16> to vector<16x128xbf16>
    %c3 = arith.constant 3 : index
    %c0_23 = arith.constant 0 : index
    %c0_24 = arith.constant 0 : index
    %39 = vector.load %arg9[%c3, %c0_23, %c0_24] : memref<10x16x128xbf16, #tpu.memory_space<vmem>>, vector<1x16x128xbf16>
    %40 = vector.shape_cast %39 : vector<1x16x128xbf16> to vector<16x128xbf16>
    %41 = vector.shape_cast %38 : vector<16x128xbf16> to vector<1x16x128xbf16>
    tpu.vector_store %arg9[%c3, %c0_23, %c0_24], %41 {strides = array<i32>} : memref<10x16x128xbf16, #tpu.memory_space<vmem>>, vector<1x16x128xbf16>,
    %c4 = arith.constant 4 : index
    %c0_25 = arith.constant 0 : index
    %c0_26 = arith.constant 0 : index
    %42 = vector.load %arg9[%c4, %c0_25, %c0_26] : memref<10x16x128xbf16, #tpu.memory_space<vmem>>, vector<1x16x128xbf16>
    %43 = vector.shape_cast %42 : vector<1x16x128xbf16> to vector<16x128xbf16>
    %44 = vector.shape_cast %38 : vector<16x128xbf16> to vector<1x16x128xbf16>
    tpu.vector_store %arg9[%c4, %c0_25, %c0_26], %44 {strides = array<i32>} : memref<10x16x128xbf16, #tpu.memory_space<vmem>>, vector<1x16x128xbf16>,
    %45 = vector.extract_strided_slice %30 {offsets = [0, 256], sizes = [16, 128], strides = [1, 1]} : vector<16x512xbf16> to vector<16x128xbf16>
    %c5 = arith.constant 5 : index
    %c0_27 = arith.constant 0 : index
    %c0_28 = arith.constant 0 : index
    %46 = vector.load %arg9[%c5, %c0_27, %c0_28] : memref<10x16x128xbf16, #tpu.memory_space<vmem>>, vector<1x16x128xbf16>
    %47 = vector.shape_cast %46 : vector<1x16x128xbf16> to vector<16x128xbf16>
    %48 = vector.shape_cast %45 : vector<16x128xbf16> to vector<1x16x128xbf16>
    tpu.vector_store %arg9[%c5, %c0_27, %c0_28], %48 {strides = array<i32>} : memref<10x16x128xbf16, #tpu.memory_space<vmem>>, vector<1x16x128xbf16>,
    %c6 = arith.constant 6 : index
    %c0_29 = arith.constant 0 : index
    %c0_30 = arith.constant 0 : index
    %49 = vector.load %arg9[%c6, %c0_29, %c0_30] : memref<10x16x128xbf16, #tpu.memory_space<vmem>>, vector<1x16x128xbf16>
    %50 = vector.shape_cast %49 : vector<1x16x128xbf16> to vector<16x128xbf16>
    %51 = vector.shape_cast %45 : vector<16x128xbf16> to vector<1x16x128xbf16>
    tpu.vector_store %arg9[%c6, %c0_29, %c0_30], %51 {strides = array<i32>} : memref<10x16x128xbf16, #tpu.memory_space<vmem>>, vector<1x16x128xbf16>,
    %52 = vector.extract_strided_slice %30 {offsets = [0, 384], sizes = [16, 128], strides = [1, 1]} : vector<16x512xbf16> to vector<16x128xbf16>
    %c7 = arith.constant 7 : index
    %c0_31 = arith.constant 0 : index
    %c0_32 = arith.constant 0 : index
    %53 = vector.load %arg9[%c7, %c0_31, %c0_32] : memref<10x16x128xbf16, #tpu.memory_space<vmem>>, vector<1x16x128xbf16>
    %54 = vector.shape_cast %53 : vector<1x16x128xbf16> to vector<16x128xbf16>
    %55 = vector.shape_cast %52 : vector<16x128xbf16> to vector<1x16x128xbf16>
    tpu.vector_store %arg9[%c7, %c0_31, %c0_32], %55 {strides = array<i32>} : memref<10x16x128xbf16, #tpu.memory_space<vmem>>, vector<1x16x128xbf16>,
    %c8_33 = arith.constant 8 : index
    %c0_34 = arith.constant 0 : index
    %c0_35 = arith.constant 0 : index
    %56 = vector.load %arg9[%c8_33, %c0_34, %c0_35] : memref<10x16x128xbf16, #tpu.memory_space<vmem>>, vector<1x16x128xbf16>
    %57 = vector.shape_cast %56 : vector<1x16x128xbf16> to vector<16x128xbf16>
    %58 = vector.shape_cast %52 : vector<16x128xbf16> to vector<1x16x128xbf16>
    tpu.vector_store %arg9[%c8_33, %c0_34, %c0_35], %58 {strides = array<i32>} : memref<10x16x128xbf16, #tpu.memory_space<vmem>>, vector<1x16x128xbf16>,
    %c0_36 = arith.constant 0 : index
    %c0_37 = arith.constant 0 : index
    %59 = vector.load %arg5[%c0_36, %c0_37] : memref<1x256xf32, #tpu.memory_space<vmem>>, vector<1x256xf32>
    %c0_38 = arith.constant 0 : index
    %c0_39 = arith.constant 0 : index
    %c0_40 = arith.constant 0 : index
    %60 = vector.load %arg9[%c0_38, %c0_39, %c0_40] : memref<10x16x128xbf16, #tpu.memory_space<vmem>>, vector<8x16x128xbf16>
    %61 = vector.shape_cast %60 : vector<8x16x128xbf16> to vector<128x128xbf16>
    %c0_41 = arith.constant 0 : index
    %c0_42 = arith.constant 0 : index
    %c0_43 = arith.constant 0 : index
    %62 = vector.load %arg4[%c0_41, %c0_42, %c0_43] : memref<3x128x256xbf16, #tpu.memory_space<vmem>>, vector<1x128x256xbf16>
    %63 = vector.shape_cast %62 : vector<1x128x256xbf16> to vector<128x256xbf16>
    %cst_44 = arith.constant dense<0.000000e+00> : vector<128x256xf32>
    %64 = tpu.matmul %61, %63, %cst_44 {dimension_numbers = #tpu.dot_dimension_numbers<[1], [0], [0], [1], [0, 0, 1, 1], [], []>} : vector<128x128xbf16>, vector<128x256xbf16>, vector<128x256xf32> -> vector<128x256xf32>
    %65 = vector.broadcast %59 : vector<1x256xf32> to vector<128x256xf32>
    %66 = arith.addf %65, %64 : vector<128x256xf32>
    %c1_45 = arith.constant 1 : index
    %c0_46 = arith.constant 0 : index
    %c0_47 = arith.constant 0 : index
    %67 = vector.load %arg9[%c1_45, %c0_46, %c0_47] : memref<10x16x128xbf16, #tpu.memory_space<vmem>>, vector<8x16x128xbf16>
    %68 = vector.shape_cast %67 : vector<8x16x128xbf16> to vector<128x128xbf16>
    %c1_48 = arith.constant 1 : index
    %c0_49 = arith.constant 0 : index
    %c0_50 = arith.constant 0 : index
    %69 = vector.load %arg4[%c1_48, %c0_49, %c0_50] : memref<3x128x256xbf16, #tpu.memory_space<vmem>>, vector<1x128x256xbf16>
    %70 = vector.shape_cast %69 : vector<1x128x256xbf16> to vector<128x256xbf16>
    %cst_51 = arith.constant dense<0.000000e+00> : vector<128x256xf32>
    %71 = tpu.matmul %68, %70, %cst_51 {dimension_numbers = #tpu.dot_dimension_numbers<[1], [0], [0], [1], [0, 0, 1, 1], [], []>} : vector<128x128xbf16>, vector<128x256xbf16>, vector<128x256xf32> -> vector<128x256xf32>
    %72 = arith.addf %66, %71 : vector<128x256xf32>
    %c2_52 = arith.constant 2 : index
    %c0_53 = arith.constant 0 : index
    %c0_54 = arith.constant 0 : index
    %73 = vector.load %arg9[%c2_52, %c0_53, %c0_54] : memref<10x16x128xbf16, #tpu.memory_space<vmem>>, vector<8x16x128xbf16>
    %74 = vector.shape_cast %73 : vector<8x16x128xbf16> to vector<128x128xbf16>
    %c2_55 = arith.constant 2 : index
    %c0_56 = arith.constant 0 : index
    %c0_57 = arith.constant 0 : index
    %75 = vector.load %arg4[%c2_55, %c0_56, %c0_57] : memref<3x128x256xbf16, #tpu.memory_space<vmem>>, vector<1x128x256xbf16>
    %76 = vector.shape_cast %75 : vector<1x128x256xbf16> to vector<128x256xbf16>
    %cst_58 = arith.constant dense<0.000000e+00> : vector<128x256xf32>
    %77 = tpu.matmul %74, %76, %cst_58 {dimension_numbers = #tpu.dot_dimension_numbers<[1], [0], [0], [1], [0, 0, 1, 1], [], []>} : vector<128x128xbf16>, vector<128x256xbf16>, vector<128x256xf32> -> vector<128x256xf32>
    %78 = arith.addf %72, %77 : vector<128x256xf32>
    %79 = vector.extract_strided_slice %78 {offsets = [0, 0], sizes = [128, 128], strides = [1, 1]} : vector<128x256xf32> to vector<128x128xf32>
    %80 = vector.extract_strided_slice %78 {offsets = [0, 128], sizes = [128, 128], strides = [1, 1]} : vector<128x256xf32> to vector<128x128xf32>
    %cst_59 = arith.constant 0.000000e+00 : f32
    %81 = vector.broadcast %cst_59 : f32 to vector<128x128xf32>
    %82 = arith.subf %81, %80 : vector<128x128xf32>
    %83 = math.exp %82 : vector<128x128xf32>
    %cst_60 = arith.constant 1.000000e+00 : f32
    %84 = vector.broadcast %cst_60 : f32 to vector<128x128xf32>
    %85 = arith.addf %84, %83 : vector<128x128xf32>
    %86 = tpu.reciprocal %85 {approx = true} : vector<128x128xf32> -> vector<128x128xf32>
    %87 = arith.mulf %79, %86 : vector<128x128xf32>
    %88 = arith.truncf %87 : vector<128x128xf32> to vector<128x128xbf16>
    %89 = vector.shape_cast %88 : vector<128x128xbf16> to vector<8x16x128xbf16>
    %90 = vector.extract_strided_slice %89 {offsets = [0, 0, 0], sizes = [1, 16, 128], strides = [1, 1, 1]} : vector<8x16x128xbf16> to vector<1x16x128xbf16>
    %91 = vector.shape_cast %90 : vector<1x16x128xbf16> to vector<16x128xbf16>
    %c0_61 = arith.constant 0 : index
    %c0_62 = arith.constant 0 : index
    %c0_63 = arith.constant 0 : index
    %92 = vector.load %arg11[%c0_61, %c0_62, %c0_63] : memref<9x16x128xbf16, #tpu.memory_space<vmem>>, vector<1x16x128xbf16>
    %93 = vector.shape_cast %92 : vector<1x16x128xbf16> to vector<16x128xbf16>
    %94 = vector.shape_cast %91 : vector<16x128xbf16> to vector<1x16x128xbf16>
    tpu.vector_store %arg11[%c0_61, %c0_62, %c0_63], %94 {strides = array<i32>} : memref<9x16x128xbf16, #tpu.memory_space<vmem>>, vector<1x16x128xbf16>,
    %95 = vector.extract_strided_slice %89 {offsets = [0, 0, 0], sizes = [1, 16, 128], strides = [1, 1, 1]} : vector<8x16x128xbf16> to vector<1x16x128xbf16>
    %96 = vector.shape_cast %95 : vector<1x16x128xbf16> to vector<16x128xbf16>
    %c1_64 = arith.constant 1 : index
    %c0_65 = arith.constant 0 : index
    %c0_66 = arith.constant 0 : index
    %97 = vector.load %arg10[%c1_64, %c0_65, %c0_66] : memref<9x16x128xbf16, #tpu.memory_space<vmem>>, vector<1x16x128xbf16>
    %98 = vector.shape_cast %97 : vector<1x16x128xbf16> to vector<16x128xbf16>
    %99 = vector.shape_cast %96 : vector<16x128xbf16> to vector<1x16x128xbf16>
    tpu.vector_store %arg10[%c1_64, %c0_65, %c0_66], %99 {strides = array<i32>} : memref<9x16x128xbf16, #tpu.memory_space<vmem>>, vector<1x16x128xbf16>,
    %100 = vector.extract_strided_slice %89 {offsets = [1, 0, 0], sizes = [1, 16, 128], strides = [1, 1, 1]} : vector<8x16x128xbf16> to vector<1x16x128xbf16>
    %101 = vector.shape_cast %100 : vector<1x16x128xbf16> to vector<16x128xbf16>
    %c1_67 = arith.constant 1 : index
    %c0_68 = arith.constant 0 : index
    %c0_69 = arith.constant 0 : index
    %102 = vector.load %arg11[%c1_67, %c0_68, %c0_69] : memref<9x16x128xbf16, #tpu.memory_space<vmem>>, vector<1x16x128xbf16>
    %103 = vector.shape_cast %102 : vector<1x16x128xbf16> to vector<16x128xbf16>
    %104 = vector.shape_cast %101 : vector<16x128xbf16> to vector<1x16x128xbf16>
    tpu.vector_store %arg11[%c1_67, %c0_68, %c0_69], %104 {strides = array<i32>} : memref<9x16x128xbf16, #tpu.memory_space<vmem>>, vector<1x16x128xbf16>,
    %105 = vector.extract_strided_slice %89 {offsets = [1, 0, 0], sizes = [1, 16, 128], strides = [1, 1, 1]} : vector<8x16x128xbf16> to vector<1x16x128xbf16>
    %106 = vector.shape_cast %105 : vector<1x16x128xbf16> to vector<16x128xbf16>
    %c2_70 = arith.constant 2 : index
    %c0_71 = arith.constant 0 : index
    %c0_72 = arith.constant 0 : index
    %107 = vector.load %arg10[%c2_70, %c0_71, %c0_72] : memref<9x16x128xbf16, #tpu.memory_space<vmem>>, vector<1x16x128xbf16>
    %108 = vector.shape_cast %107 : vector<1x16x128xbf16> to vector<16x128xbf16>
    %109 = vector.shape_cast %106 : vector<16x128xbf16> to vector<1x16x128xbf16>
    tpu.vector_store %arg10[%c2_70, %c0_71, %c0_72], %109 {strides = array<i32>} : memref<9x16x128xbf16, #tpu.memory_space<vmem>>, vector<1x16x128xbf16>,
    %110 = vector.extract_strided_slice %89 {offsets = [2, 0, 0], sizes = [1, 16, 128], strides = [1, 1, 1]} : vector<8x16x128xbf16> to vector<1x16x128xbf16>
    %111 = vector.shape_cast %110 : vector<1x16x128xbf16> to vector<16x128xbf16>
    %c2_73 = arith.constant 2 : index
    %c0_74 = arith.constant 0 : index
    %c0_75 = arith.constant 0 : index
    %112 = vector.load %arg11[%c2_73, %c0_74, %c0_75] : memref<9x16x128xbf16, #tpu.memory_space<vmem>>, vector<1x16x128xbf16>
    %113 = vector.shape_cast %112 : vector<1x16x128xbf16> to vector<16x128xbf16>
    %114 = vector.shape_cast %111 : vector<16x128xbf16> to vector<1x16x128xbf16>
    tpu.vector_store %arg11[%c2_73, %c0_74, %c0_75], %114 {strides = array<i32>} : memref<9x16x128xbf16, #tpu.memory_space<vmem>>, vector<1x16x128xbf16>,
    %115 = vector.extract_strided_slice %89 {offsets = [2, 0, 0], sizes = [1, 16, 128], strides = [1, 1, 1]} : vector<8x16x128xbf16> to vector<1x16x128xbf16>
    %116 = vector.shape_cast %115 : vector<1x16x128xbf16> to vector<16x128xbf16>
    %c3_76 = arith.constant 3 : index
    %c0_77 = arith.constant 0 : index
    %c0_78 = arith.constant 0 : index
    %117 = vector.load %arg10[%c3_76, %c0_77, %c0_78] : memref<9x16x128xbf16, #tpu.memory_space<vmem>>, vector<1x16x128xbf16>
    %118 = vector.shape_cast %117 : vector<1x16x128xbf16> to vector<16x128xbf16>
    %119 = vector.shape_cast %116 : vector<16x128xbf16> to vector<1x16x128xbf16>
    tpu.vector_store %arg10[%c3_76, %c0_77, %c0_78], %119 {strides = array<i32>} : memref<9x16x128xbf16, #tpu.memory_space<vmem>>, vector<1x16x128xbf16>,
    %120 = vector.extract_strided_slice %89 {offsets = [3, 0, 0], sizes = [1, 16, 128], strides = [1, 1, 1]} : vector<8x16x128xbf16> to vector<1x16x128xbf16>
    %121 = vector.shape_cast %120 : vector<1x16x128xbf16> to vector<16x128xbf16>
    %c3_79 = arith.constant 3 : index
    %c0_80 = arith.constant 0 : index
    %c0_81 = arith.constant 0 : index
    %122 = vector.load %arg11[%c3_79, %c0_80, %c0_81] : memref<9x16x128xbf16, #tpu.memory_space<vmem>>, vector<1x16x128xbf16>
    %123 = vector.shape_cast %122 : vector<1x16x128xbf16> to vector<16x128xbf16>
    %124 = vector.shape_cast %121 : vector<16x128xbf16> to vector<1x16x128xbf16>
    tpu.vector_store %arg11[%c3_79, %c0_80, %c0_81], %124 {strides = array<i32>} : memref<9x16x128xbf16, #tpu.memory_space<vmem>>, vector<1x16x128xbf16>,
    %125 = vector.extract_strided_slice %89 {offsets = [3, 0, 0], sizes = [1, 16, 128], strides = [1, 1, 1]} : vector<8x16x128xbf16> to vector<1x16x128xbf16>
    %126 = vector.shape_cast %125 : vector<1x16x128xbf16> to vector<16x128xbf16>
    %c4_82 = arith.constant 4 : index
    %c0_83 = arith.constant 0 : index
    %c0_84 = arith.constant 0 : index
    %127 = vector.load %arg10[%c4_82, %c0_83, %c0_84] : memref<9x16x128xbf16, #tpu.memory_space<vmem>>, vector<1x16x128xbf16>
    %128 = vector.shape_cast %127 : vector<1x16x128xbf16> to vector<16x128xbf16>
    %129 = vector.shape_cast %126 : vector<16x128xbf16> to vector<1x16x128xbf16>
    tpu.vector_store %arg10[%c4_82, %c0_83, %c0_84], %129 {strides = array<i32>} : memref<9x16x128xbf16, #tpu.memory_space<vmem>>, vector<1x16x128xbf16>,
    %130 = vector.extract_strided_slice %89 {offsets = [4, 0, 0], sizes = [1, 16, 128], strides = [1, 1, 1]} : vector<8x16x128xbf16> to vector<1x16x128xbf16>
    %131 = vector.shape_cast %130 : vector<1x16x128xbf16> to vector<16x128xbf16>
    %c4_85 = arith.constant 4 : index
    %c0_86 = arith.constant 0 : index
    %c0_87 = arith.constant 0 : index
    %132 = vector.load %arg11[%c4_85, %c0_86, %c0_87] : memref<9x16x128xbf16, #tpu.memory_space<vmem>>, vector<1x16x128xbf16>
    %133 = vector.shape_cast %132 : vector<1x16x128xbf16> to vector<16x128xbf16>
    %134 = vector.shape_cast %131 : vector<16x128xbf16> to vector<1x16x128xbf16>
    tpu.vector_store %arg11[%c4_85, %c0_86, %c0_87], %134 {strides = array<i32>} : memref<9x16x128xbf16, #tpu.memory_space<vmem>>, vector<1x16x128xbf16>,
    %135 = vector.extract_strided_slice %89 {offsets = [4, 0, 0], sizes = [1, 16, 128], strides = [1, 1, 1]} : vector<8x16x128xbf16> to vector<1x16x128xbf16>
    %136 = vector.shape_cast %135 : vector<1x16x128xbf16> to vector<16x128xbf16>
    %c5_88 = arith.constant 5 : index
    %c0_89 = arith.constant 0 : index
    %c0_90 = arith.constant 0 : index
    %137 = vector.load %arg10[%c5_88, %c0_89, %c0_90] : memref<9x16x128xbf16, #tpu.memory_space<vmem>>, vector<1x16x128xbf16>
    %138 = vector.shape_cast %137 : vector<1x16x128xbf16> to vector<16x128xbf16>
    %139 = vector.shape_cast %136 : vector<16x128xbf16> to vector<1x16x128xbf16>
    tpu.vector_store %arg10[%c5_88, %c0_89, %c0_90], %139 {strides = array<i32>} : memref<9x16x128xbf16, #tpu.memory_space<vmem>>, vector<1x16x128xbf16>,
    %140 = vector.extract_strided_slice %89 {offsets = [5, 0, 0], sizes = [1, 16, 128], strides = [1, 1, 1]} : vector<8x16x128xbf16> to vector<1x16x128xbf16>
    %141 = vector.shape_cast %140 : vector<1x16x128xbf16> to vector<16x128xbf16>
    %c5_91 = arith.constant 5 : index
    %c0_92 = arith.constant 0 : index
    %c0_93 = arith.constant 0 : index
    %142 = vector.load %arg11[%c5_91, %c0_92, %c0_93] : memref<9x16x128xbf16, #tpu.memory_space<vmem>>, vector<1x16x128xbf16>
    %143 = vector.shape_cast %142 : vector<1x16x128xbf16> to vector<16x128xbf16>
    %144 = vector.shape_cast %141 : vector<16x128xbf16> to vector<1x16x128xbf16>
    tpu.vector_store %arg11[%c5_91, %c0_92, %c0_93], %144 {strides = array<i32>} : memref<9x16x128xbf16, #tpu.memory_space<vmem>>, vector<1x16x128xbf16>,
    %145 = vector.extract_strided_slice %89 {offsets = [5, 0, 0], sizes = [1, 16, 128], strides = [1, 1, 1]} : vector<8x16x128xbf16> to vector<1x16x128xbf16>
    %146 = vector.shape_cast %145 : vector<1x16x128xbf16> to vector<16x128xbf16>
    %c6_94 = arith.constant 6 : index
    %c0_95 = arith.constant 0 : index
    %c0_96 = arith.constant 0 : index
    %147 = vector.load %arg10[%c6_94, %c0_95, %c0_96] : memref<9x16x128xbf16, #tpu.memory_space<vmem>>, vector<1x16x128xbf16>
    %148 = vector.shape_cast %147 : vector<1x16x128xbf16> to vector<16x128xbf16>
    %149 = vector.shape_cast %146 : vector<16x128xbf16> to vector<1x16x128xbf16>
    tpu.vector_store %arg10[%c6_94, %c0_95, %c0_96], %149 {strides = array<i32>} : memref<9x16x128xbf16, #tpu.memory_space<vmem>>, vector<1x16x128xbf16>,
    %150 = vector.extract_strided_slice %89 {offsets = [6, 0, 0], sizes = [1, 16, 128], strides = [1, 1, 1]} : vector<8x16x128xbf16> to vector<1x16x128xbf16>
    %151 = vector.shape_cast %150 : vector<1x16x128xbf16> to vector<16x128xbf16>
    %c6_97 = arith.constant 6 : index
    %c0_98 = arith.constant 0 : index
    %c0_99 = arith.constant 0 : index
    %152 = vector.load %arg11[%c6_97, %c0_98, %c0_99] : memref<9x16x128xbf16, #tpu.memory_space<vmem>>, vector<1x16x128xbf16>
    %153 = vector.shape_cast %152 : vector<1x16x128xbf16> to vector<16x128xbf16>
    %154 = vector.shape_cast %151 : vector<16x128xbf16> to vector<1x16x128xbf16>
    tpu.vector_store %arg11[%c6_97, %c0_98, %c0_99], %154 {strides = array<i32>} : memref<9x16x128xbf16, #tpu.memory_space<vmem>>, vector<1x16x128xbf16>,
    %155 = vector.extract_strided_slice %89 {offsets = [6, 0, 0], sizes = [1, 16, 128], strides = [1, 1, 1]} : vector<8x16x128xbf16> to vector<1x16x128xbf16>
    %156 = vector.shape_cast %155 : vector<1x16x128xbf16> to vector<16x128xbf16>
    %c7_100 = arith.constant 7 : index
    %c0_101 = arith.constant 0 : index
    %c0_102 = arith.constant 0 : index
    %157 = vector.load %arg10[%c7_100, %c0_101, %c0_102] : memref<9x16x128xbf16, #tpu.memory_space<vmem>>, vector<1x16x128xbf16>
    %158 = vector.shape_cast %157 : vector<1x16x128xbf16> to vector<16x128xbf16>
    %159 = vector.shape_cast %156 : vector<16x128xbf16> to vector<1x16x128xbf16>
    tpu.vector_store %arg10[%c7_100, %c0_101, %c0_102], %159 {strides = array<i32>} : memref<9x16x128xbf16, #tpu.memory_space<vmem>>, vector<1x16x128xbf16>,
    %160 = vector.extract_strided_slice %89 {offsets = [7, 0, 0], sizes = [1, 16, 128], strides = [1, 1, 1]} : vector<8x16x128xbf16> to vector<1x16x128xbf16>
    %161 = vector.shape_cast %160 : vector<1x16x128xbf16> to vector<16x128xbf16>
    %c7_103 = arith.constant 7 : index
    %c0_104 = arith.constant 0 : index
    %c0_105 = arith.constant 0 : index
    %162 = vector.load %arg11[%c7_103, %c0_104, %c0_105] : memref<9x16x128xbf16, #tpu.memory_space<vmem>>, vector<1x16x128xbf16>
    %163 = vector.shape_cast %162 : vector<1x16x128xbf16> to vector<16x128xbf16>
    %164 = vector.shape_cast %161 : vector<16x128xbf16> to vector<1x16x128xbf16>
    tpu.vector_store %arg11[%c7_103, %c0_104, %c0_105], %164 {strides = array<i32>} : memref<9x16x128xbf16, #tpu.memory_space<vmem>>, vector<1x16x128xbf16>,
    %165 = vector.extract_strided_slice %89 {offsets = [7, 0, 0], sizes = [1, 16, 128], strides = [1, 1, 1]} : vector<8x16x128xbf16> to vector<1x16x128xbf16>
    %166 = vector.shape_cast %165 : vector<1x16x128xbf16> to vector<16x128xbf16>
    %c8_106 = arith.constant 8 : index
    %c0_107 = arith.constant 0 : index
    %c0_108 = arith.constant 0 : index
    %167 = vector.load %arg10[%c8_106, %c0_107, %c0_108] : memref<9x16x128xbf16, #tpu.memory_space<vmem>>, vector<1x16x128xbf16>
    %168 = vector.shape_cast %167 : vector<1x16x128xbf16> to vector<16x128xbf16>
    %169 = vector.shape_cast %166 : vector<16x128xbf16> to vector<1x16x128xbf16>
    tpu.vector_store %arg10[%c8_106, %c0_107, %c0_108], %169 {strides = array<i32>} : memref<9x16x128xbf16, #tpu.memory_space<vmem>>, vector<1x16x128xbf16>,
    %c0_109 = arith.constant 0 : index
    %c0_110 = arith.constant 0 : index
    %170 = vector.load %arg7[%c0_109, %c0_110] : memref<1x256xf32, #tpu.memory_space<vmem>>, vector<1x256xf32>
    %c0_111 = arith.constant 0 : index
    %c0_112 = arith.constant 0 : index
    %c0_113 = arith.constant 0 : index
    %171 = vector.load %arg10[%c0_111, %c0_112, %c0_113] : memref<9x16x128xbf16, #tpu.memory_space<vmem>>, vector<8x16x128xbf16>
    %c0_114 = arith.constant 0 : index
    %c0_115 = arith.constant 0 : index
    %c0_116 = arith.constant 0 : index
    %172 = vector.load %arg11[%c0_114, %c0_115, %c0_116] : memref<9x16x128xbf16, #tpu.memory_space<vmem>>, vector<8x16x128xbf16>
    %c1_117 = arith.constant 1 : index
    %c0_118 = arith.constant 0 : index
    %c0_119 = arith.constant 0 : index
    %173 = vector.load %arg10[%c1_117, %c0_118, %c0_119] : memref<9x16x128xbf16, #tpu.memory_space<vmem>>, vector<8x16x128xbf16>
    %c1_120 = arith.constant 1 : index
    %c0_121 = arith.constant 0 : index
    %c0_122 = arith.constant 0 : index
    %174 = vector.load %arg11[%c1_120, %c0_121, %c0_122] : memref<9x16x128xbf16, #tpu.memory_space<vmem>>, vector<8x16x128xbf16>
    %175 = vector.shape_cast %171 : vector<8x16x128xbf16> to vector<128x128xbf16>
    %c0_123 = arith.constant 0 : index
    %c0_124 = arith.constant 0 : index
    %c0_125 = arith.constant 0 : index
    %176 = vector.load %arg6[%c0_123, %c0_124, %c0_125] : memref<4x128x256xbf16, #tpu.memory_space<vmem>>, vector<1x128x256xbf16>
    %177 = vector.shape_cast %176 : vector<1x128x256xbf16> to vector<128x256xbf16>
    %cst_126 = arith.constant dense<0.000000e+00> : vector<128x256xf32>
    %178 = tpu.matmul %175, %177, %cst_126 {dimension_numbers = #tpu.dot_dimension_numbers<[1], [0], [0], [1], [0, 0, 1, 1], [], []>} : vector<128x128xbf16>, vector<128x256xbf16>, vector<128x256xf32> -> vector<128x256xf32>
    %179 = vector.broadcast %170 : vector<1x256xf32> to vector<128x256xf32>
    %180 = arith.addf %179, %178 : vector<128x256xf32>
    %181 = vector.shape_cast %172 : vector<8x16x128xbf16> to vector<128x128xbf16>
    %c1_127 = arith.constant 1 : index
    %c0_128 = arith.constant 0 : index
    %c0_129 = arith.constant 0 : index
    %182 = vector.load %arg6[%c1_127, %c0_128, %c0_129] : memref<4x128x256xbf16, #tpu.memory_space<vmem>>, vector<1x128x256xbf16>
    %183 = vector.shape_cast %182 : vector<1x128x256xbf16> to vector<128x256xbf16>
    %cst_130 = arith.constant dense<0.000000e+00> : vector<128x256xf32>
    %184 = tpu.matmul %181, %183, %cst_130 {dimension_numbers = #tpu.dot_dimension_numbers<[1], [0], [0], [1], [0, 0, 1, 1], [], []>} : vector<128x128xbf16>, vector<128x256xbf16>, vector<128x256xf32> -> vector<128x256xf32>
    %185 = arith.addf %180, %184 : vector<128x256xf32>
    %186 = vector.shape_cast %173 : vector<8x16x128xbf16> to vector<128x128xbf16>
    %c2_131 = arith.constant 2 : index
    %c0_132 = arith.constant 0 : index
    %c0_133 = arith.constant 0 : index
    %187 = vector.load %arg6[%c2_131, %c0_132, %c0_133] : memref<4x128x256xbf16, #tpu.memory_space<vmem>>, vector<1x128x256xbf16>
    %188 = vector.shape_cast %187 : vector<1x128x256xbf16> to vector<128x256xbf16>
    %cst_134 = arith.constant dense<0.000000e+00> : vector<128x256xf32>
    %189 = tpu.matmul %186, %188, %cst_134 {dimension_numbers = #tpu.dot_dimension_numbers<[1], [0], [0], [1], [0, 0, 1, 1], [], []>} : vector<128x128xbf16>, vector<128x256xbf16>, vector<128x256xf32> -> vector<128x256xf32>
    %190 = arith.addf %185, %189 : vector<128x256xf32>
    %191 = vector.shape_cast %174 : vector<8x16x128xbf16> to vector<128x128xbf16>
    %c3_135 = arith.constant 3 : index
    %c0_136 = arith.constant 0 : index
    %c0_137 = arith.constant 0 : index
    %192 = vector.load %arg6[%c3_135, %c0_136, %c0_137] : memref<4x128x256xbf16, #tpu.memory_space<vmem>>, vector<1x128x256xbf16>
    %193 = vector.shape_cast %192 : vector<1x128x256xbf16> to vector<128x256xbf16>
    %cst_138 = arith.constant dense<0.000000e+00> : vector<128x256xf32>
    %194 = tpu.matmul %191, %193, %cst_138 {dimension_numbers = #tpu.dot_dimension_numbers<[1], [0], [0], [1], [0, 0, 1, 1], [], []>} : vector<128x128xbf16>, vector<128x256xbf16>, vector<128x256xf32> -> vector<128x256xf32>
    %195 = arith.addf %190, %194 : vector<128x256xf32>
    %196 = vector.extract_strided_slice %195 {offsets = [0, 0], sizes = [128, 128], strides = [1, 1]} : vector<128x256xf32> to vector<128x128xf32>
    %197 = vector.extract_strided_slice %195 {offsets = [0, 128], sizes = [128, 128], strides = [1, 1]} : vector<128x256xf32> to vector<128x128xf32>
    %cst_139 = arith.constant 0.000000e+00 : f32
    %198 = vector.broadcast %cst_139 : f32 to vector<128x128xf32>
    %199 = arith.subf %198, %197 : vector<128x128xf32>
    %200 = math.exp %199 : vector<128x128xf32>
    %cst_140 = arith.constant 1.000000e+00 : f32
    %201 = vector.broadcast %cst_140 : f32 to vector<128x128xf32>
    %202 = arith.addf %201, %200 : vector<128x128xf32>
    %203 = tpu.reciprocal %202 {approx = true} : vector<128x128xf32> -> vector<128x128xf32>
    %204 = arith.mulf %196, %203 : vector<128x128xf32>
    %205 = vector.shape_cast %204 : vector<128x128xf32> to vector<8x16x128xf32>
    %c0_141 = arith.constant 0 : index
    %c0_142 = arith.constant 0 : index
    %c0_143 = arith.constant 0 : index
    %206 = vector.load %arg8[%c0_141, %c0_142, %c0_143] : memref<8x16x128xf32, #tpu.memory_space<vmem>>, vector<8x16x128xf32>
    tpu.vector_store %arg8[%c0_141, %c0_142, %c0_143], %205 {strides = array<i32>} : memref<8x16x128xf32, #tpu.memory_space<vmem>>, vector<8x16x128xf32>,
    return
  }
  func.func @transform_0(%arg0: i32) -> (i32, i32) {
    %c0_i32 = arith.constant 0 : i32
    %c0_i32_0 = arith.constant 0 : i32
    return %arg0, %c0_i32 : i32, i32
  }
  func.func @transform_1(%arg0: i32) -> (i32, i32) {
    %c0_i32 = arith.constant 0 : i32
    %c0_i32_0 = arith.constant 0 : i32
    %c0_i32_1 = arith.constant 0 : i32
    return %c0_i32, %c0_i32_0 : i32, i32
  }
  func.func @transform_2(%arg0: i32) -> (i32, i32) {
    %c0_i32 = arith.constant 0 : i32
    %c0_i32_0 = arith.constant 0 : i32
    %c0_i32_1 = arith.constant 0 : i32
    return %c0_i32, %c0_i32_0 : i32, i32
  }
  func.func @transform_3(%arg0: i32) -> (i32, i32, i32) {
    %c0_i32 = arith.constant 0 : i32
    %c0_i32_0 = arith.constant 0 : i32
    %c0_i32_1 = arith.constant 0 : i32
    %c0_i32_2 = arith.constant 0 : i32
    return %c0_i32, %c0_i32_0, %c0_i32_1 : i32, i32, i32
  }
  func.func @transform_4(%arg0: i32) -> (i32, i32) {
    %c0_i32 = arith.constant 0 : i32
    %c0_i32_0 = arith.constant 0 : i32
    %c0_i32_1 = arith.constant 0 : i32
    return %c0_i32, %c0_i32_0 : i32, i32
  }
  func.func @transform_5(%arg0: i32) -> (i32, i32, i32) {
    %c0_i32 = arith.constant 0 : i32
    %c0_i32_0 = arith.constant 0 : i32
    %c0_i32_1 = arith.constant 0 : i32
    %c0_i32_2 = arith.constant 0 : i32
    return %c0_i32, %c0_i32_0, %c0_i32_1 : i32, i32, i32
  }
  func.func @transform_6(%arg0: i32) -> (i32, i32) {
    %c0_i32 = arith.constant 0 : i32
    %c0_i32_0 = arith.constant 0 : i32
    %c0_i32_1 = arith.constant 0 : i32
    return %c0_i32, %c0_i32_0 : i32, i32
  }
  func.func @transform_7(%arg0: i32) -> (i32, i32, i32) {
    %c0_i32 = arith.constant 0 : i32
    %c0_i32_0 = arith.constant 0 : i32
    %c0_i32_1 = arith.constant 0 : i32
    return %c0_i32, %arg0, %c0_i32_0 : i32, i32, i32
  }
}

</mosaic_0001>

<bundles_post_ra>
// kernel: init_stage_g_pat_forward.1
= control target key start
LH: loop header
LB: loop body
LE: loop exit
PB: predicated region body
PF: predicated region fallthrough
CT: control target
= control target key end

     0   :  { %12 = vsyncpa [#allocation6], 0  ;;  %s3793_s0 = inlined_call_operand.vmem [shape: f32[16,32], index: 0, kind: input, shape index: {}]   ;;  %s3794_s1 = inlined_call_operand.hbm [shape: bf16[32,1024], index: 1, kind: input, shape index: {}]   ;;  %s3795_s2 = inlined_call_operand.vmem [shape: f32[1,1024], index: 2, kind: input, shape index: {}]   ;;  %s3796_s3 = inlined_call_operand.hbm [shape: bf16[3,128,256], index: 3, kind: input, shape index: {}]   ;;  %s3797_s4 = inlined_call_operand.vmem [shape: f32[1,256], index: 4, kind: input, shape index: {}]   ;;  %s3798_s5 = inlined_call_operand.hbm [shape: bf16[4,128,256], index: 5, kind: input, shape index: {}]   ;;  %s3799_s6 = inlined_call_operand.vmem [shape: f32[1,256], index: 6, kind: input, shape index: {}]   ;;  %s3800_s7 = inlined_call_operand.vmem [shape: f32[8,16,128], index: 7, kind: output, shape index: {}]  }
   0x1   :  { %13 = vsyncpa [#allocation8], 0  ;;  %s3262_s24 = smov [#allocation7]   ;;  %s3192_s28 = scalar_lea.hbm %s3796_s3, 6144 }
   0x2   :  { %s35_s25 = sshll.u32 %s3262_s24, 4  ;;  %p3193_p0 = scmp.ne.s32.totalorder %s3796_s3, %s3192_s28  ;;  %s36_s25 = int_to_ptr.vmem [resolvable:$true] %s35_s25 }
   0x3   :  { %p3196_p1 = scmp.lt.u32.totalorder %s3192_s28, %s3796_s3 }
   0x5   :  { %p3198_p2 = pnand %p3196_p1, %p3193_p0 }
   0x7   :  { %3201 = shalt.err (!%p3198_p2)
}
   0x8   :  { %s3202_s10 = scalar_lea.vmem %s36_s25, 6144  ;;  %p3207_p4 = scmp.lt.s32.totalorder %s36_s25, %s36_s25 }
   0x9   :  { %p3203_p3 = scmp.ne.s32.totalorder %s36_s25, %s3202_s10  ;;  %p3208_p5 = scmp.lt.s32.totalorder %s3202_s10, %s3202_s10 }
   0xb   :  { %p3209_p6 = por %p3208_p5, %p3207_p4 }
   0xd   :  { %p3210_p7 = pnand %p3209_p6, %p3203_p3 }
   0xf   :  { %3213 = shalt.err (!%p3210_p7)
}
  0x10   :  { %s3263_s11 = smov 128   ;;  %s3264_s12 = smov 8  }
  0x11   :  { %41 = dma.hbm_to_vmem [thread:$0]  %s3796_s3, 6144, %s36_s25, [#allocation8], %s3263_s11, %s3263_s11, %s3264_s12  }
  0x12   :  { %s3265_s15 = smov [#allocation5]   ;;  %s3214_s19 = scalar_lea.hbm %s3794_s1, 2048 }
  0x13   :  { %s21_s16 = sshll.u32 %s3265_s15, 4  ;;  %p3215_p8 = scmp.ne.s32.totalorder %s3794_s1, %s3214_s19  ;;  %s22_s16 = int_to_ptr.vmem [resolvable:$true] %s21_s16 }
  0x14   :  { %p3218_p9 = scmp.lt.u32.totalorder %s3214_s19, %s3794_s1 }
  0x16   :  { %p3220_p10 = pnand %p3218_p9, %p3215_p8 }
  0x18   :  { %3223 = shalt.err (!%p3220_p10)
}
  0x19   :  { %s3224_s24 = scalar_lea.vmem %s22_s16, 2048  ;;  %p3229_p12 = scmp.lt.s32.totalorder %s22_s16, %s22_s16 }
  0x1a   :  { %p3225_p11 = scmp.ne.s32.totalorder %s22_s16, %s3224_s24  ;;  %p3230_p13 = scmp.lt.s32.totalorder %s3224_s24, %s3224_s24 }
  0x1c   :  { %p3231_p0 = por %p3230_p13, %p3229_p12 }
  0x1e   :  { %p3232_p1 = pnand %p3231_p0, %p3225_p11 }
  0x20   :  { %3235 = shalt.err (!%p3232_p1)
}
  0x21   :  { %s3266_s3 = smov 512   ;;  %s3267_s25 = smov 32  }
  0x22   :  { %27 = dma.hbm_to_vmem [thread:$0]  %s3794_s1, 2048, %s22_s16, [#allocation6], %s3266_s3, %s3266_s3, %s3267_s25  }
  0x23   :  { %s3268_s28 = smov [#allocation9]   ;;  %s3236_s9 = scalar_lea.hbm %s3798_s5, 8192 }
  0x24   :  { %s49_s29 = sshll.u32 %s3268_s28, 4  ;;  %p3237_p2 = scmp.ne.s32.totalorder %s3798_s5, %s3236_s9  ;;  %s50_s29 = int_to_ptr.vmem [resolvable:$true] %s49_s29 }
  0x25   :  { %p3240_p3 = scmp.lt.u32.totalorder %s3236_s9, %s3798_s5 }
  0x27   :  { %p3242_p4 = pnand %p3240_p3, %p3237_p2 }
  0x29   :  { %3245 = shalt.err (!%p3242_p4)
}
  0x2a   :  { %s3246_s17 = scalar_lea.vmem %s50_s29, 8192  ;;  %p3251_p6 = scmp.lt.s32.totalorder %s50_s29, %s50_s29 }
  0x2b   :  { %p3247_p5 = scmp.ne.s32.totalorder %s50_s29, %s3246_s17  ;;  %p3252_p7 = scmp.lt.s32.totalorder %s3246_s17, %s3246_s17 }
  0x2d   :  { %p3253_p8 = por %p3252_p7, %p3251_p6 }
  0x2f   :  { %p3254_p9 = pnand %p3253_p8, %p3247_p5 }
  0x31   :  { %3257 = shalt.err (!%p3254_p9)
}
  0x32   :  { %55 = dma.hbm_to_vmem [thread:$0]  %s3798_s5, 8192, %s50_s29, [#allocation8], %s3263_s11, %s3263_s11, %s3264_s12  }
  0x33   :  { %3258 = dma.done.wait [#allocation6], 2048  }
  0x34   :  { %3259 = vsyncadd [#allocation6], 4294965248 }
  0x35   :  { %3260 = dma.done.wait [#allocation8], 14336  }
  0x36   :  { %3261 = vsyncadd [#allocation8], 4294952960  ;;  %v3269_v0 = vmov 0   ;;  %v77_v1 = vld [vmem:[#allocation5] sm:$0xff]  ;;  %v78_v3 = vld [vmem:[#allocation5 + $0x8] sm:$0xff]  ;;  %vm215_vm0 = vcmask 261120  }
  0x37   :  { %251 = vmatprep.mubr.bf16.mxu0 %v3269_v0  ;;  %294 = vmatprep.mubr.bf16.mxu1 %v3269_v0  ;;  %v81_v2 = vld [vmem:[#allocation5 + $0x20] sm:$0xff]  ;;  %v82_v5 = vld [vmem:[#allocation5 + $0x28] sm:$0xff]  ;;  %v79_v16 = vld [vmem:[#allocation5 + $0x10] sm:$0xff] }
  0x38   :  { %v2485_v4 = vcombine.high %v77_v1, %v81_v2  ;;  %v2484_v6 = vcombine.low %v77_v1, %v81_v2  ;;  %v85_v7 = vld [vmem:[#allocation5 + $0x40] sm:$0xff]  ;;  %v2487_v9 = vcombine.high %v78_v3, %v82_v5  ;;  %v2486_v10 = vcombine.low %v78_v3, %v82_v5  ;;  %v86_v12 = vld [vmem:[#allocation5 + $0x48] sm:$0xff]  ;;  %v83_v17 = vld [vmem:[#allocation5 + $0x30] sm:$0xff] }
  0x39   :  { %v89_v8 = vld [vmem:[#allocation5 + $0x60] sm:$0xff]  ;;  %v90_v13 = vld [vmem:[#allocation5 + $0x68] sm:$0xff]  ;;  %v80_v20 = vld [vmem:[#allocation5 + $0x18] sm:$0xff]  ;;  %v2489_v23 = vcombine.high %v79_v16, %v83_v17  ;;  %v2488_v30 = vcombine.low %v79_v16, %v83_v17 }
  0x3a   :  { %v2493_v11 = vcombine.high %v85_v7, %v89_v8  ;;  %219 = vmatprep.subr.bf16.mxu0 %v2485_v4  ;;  %v2495_v14 = vcombine.high %v86_v12, %v90_v13  ;;  %v74_v15 = vld [vmem:[%s3793_s0] sm:$0xff]  ;;  %262 = vmatprep.subr.bf16.mxu1 %v2487_v9  ;;  %v2492_v18 = vcombine.low %v85_v7, %v89_v8  ;;  %v75_v19 = vld [vmem:[%s3793_s0 + $0x8] sm:$0xff]  ;;  %v84_v21 = vld [vmem:[#allocation5 + $0x38] sm:$0xff] }
  0x3b   :  { %220 = vmatpush1.bf16.msra.mxu0 %v2484_v6  ;;  %263 = vmatpush1.bf16.msra.mxu1 %v2486_v10  ;;  %v2494_v22 = vcombine.low %v86_v12, %v90_v13  ;;  %v87_v24 = vld [vmem:[#allocation5 + $0x50] sm:$0xff]  ;;  %v88_v26 = vld [vmem:[#allocation5 + $0x58] sm:$0xff]  ;;  %v2491_v27 = vcombine.high %v80_v20, %v84_v21  ;;  %v76_v29 = vpack.c.bf16 %v75_v19, %v74_v15  ;;  %v2864_v36 = vld [vmem:[#allocation7] ss:$8 sps:$4 sm:$0xff]   ;;  %v95_v6 = vlaneseq }
  0x3c   :  { %221 = vmatprep.subr.bf16.mxu0 %v2493_v11  ;;  %v91_v25 = vld [vmem:[#allocation5 + $0x70] sm:$0xff]  ;;  %264 = vmatprep.subr.bf16.mxu1 %v2495_v14  ;;  %v92_v28 = vld [vmem:[#allocation5 + $0x78] sm:$0xff]  ;;  %v2490_v31 = vcombine.low %v80_v20, %v84_v21  ;;  %v2866_v37 = vld [vmem:[#allocation7 + $0x4] ss:$8 sps:$4 sm:$0xff]  }
  0x3d   :  { %v2497_v32 = vcombine.high %v87_v24, %v91_v25  ;;  %v2499_v33 = vcombine.high %v88_v26, %v92_v28  ;;  %v2496_v34 = vcombine.low %v87_v24, %v91_v25  ;;  %v2498_v35 = vcombine.low %v88_v26, %v92_v28  ;;  %v2869_v38 = vld [vmem:[#allocation7 + $0x14] ss:$8 sps:$4 sm:$0xff]   ;;  %v2867_v39 = vld [vmem:[#allocation7 + $0x10] ss:$8 sps:$4 sm:$0xff]   ;;  %v2872_v40 = vld [vmem:[#allocation7 + $0x24] ss:$8 sps:$4 sm:$0xff]  }
  0x3e   :  { %v2870_v41 = vld [vmem:[#allocation7 + $0x20] ss:$8 sps:$4 sm:$0xff]   ;;  %v2875_v42 = vld [vmem:[#allocation7 + $0x34] ss:$8 sps:$4 sm:$0xff]   ;;  %v2873_v43 = vld [vmem:[#allocation7 + $0x30] ss:$8 sps:$4 sm:$0xff]  }
  0x3f   :  { %222 = vmatpush1.bf16.msra.mxu0 %v2492_v18  ;;  %265 = vmatpush1.bf16.msra.mxu1 %v2494_v22  ;;  %v2878_v44 = vld [vmem:[#allocation7 + $0x44] ss:$8 sps:$4 sm:$0xff]   ;;  %v2876_v45 = vld [vmem:[#allocation7 + $0x40] ss:$8 sps:$4 sm:$0xff]   ;;  %v2881_v46 = vld [vmem:[#allocation7 + $0x54] ss:$8 sps:$4 sm:$0xff]  }
  0x40   :  { %305 = vmatprep.subr.bf16.mxu0 %v2489_v23  ;;  %348 = vmatprep.subr.bf16.mxu1 %v2491_v27  ;;  %v2879_v47 = vld [vmem:[#allocation7 + $0x50] ss:$8 sps:$4 sm:$0xff]   ;;  %v2884_v48 = vld [vmem:[#allocation7 + $0x64] ss:$8 sps:$4 sm:$0xff]   ;;  %v2882_v49 = vld [vmem:[#allocation7 + $0x60] ss:$8 sps:$4 sm:$0xff]  }
  0x41   :  { %v2887_v50 = vld [vmem:[#allocation7 + $0x74] ss:$8 sps:$4 sm:$0xff]   ;;  %v2885_v51 = vld [vmem:[#allocation7 + $0x70] ss:$8 sps:$4 sm:$0xff]   ;;  %v2888_v52 = vld [vmem:[#allocation7 + $0x80] ss:$8 sps:$4 sm:$0xff]  }
  0x42   :  { %2500 = vmatmul.mubr.msk.bf16.vlgmr.msra.gmra.mrb[0].mxu0 %vm215_vm0, %v76_v29  ;;  %2501 = vmatmul.mubr.msk.bf16.vlgmr.msra.gmra.mrb[0].mxu1 %vm215_vm0, %v76_v29  ;;  %v2890_v53 = vld [vmem:[#allocation7 + $0x84] ss:$8 sps:$4 sm:$0xff]   ;;  %v2893_v54 = vld [vmem:[#allocation7 + $0x94] ss:$8 sps:$4 sm:$0xff]   ;;  %v2891_v55 = vld [vmem:[#allocation7 + $0x90] ss:$8 sps:$4 sm:$0xff]  }
  0x43   :  { %306 = vmatpush1.bf16.msra.mxu0 %v2488_v30  ;;  %349 = vmatpush1.bf16.msra.mxu1 %v2490_v31  ;;  %v2894_v56 = vld [vmem:[#allocation7 + $0xa0] ss:$8 sps:$4 sm:$0xff]   ;;  %v2896_v57 = vld [vmem:[#allocation7 + $0xa4] ss:$8 sps:$4 sm:$0xff]   ;;  %v2897_v58 = vld [vmem:[#allocation7 + $0xb0] ss:$8 sps:$4 sm:$0xff]  }
  0x44   :  { %307 = vmatprep.subr.bf16.mxu0 %v2497_v32  ;;  %350 = vmatprep.subr.bf16.mxu1 %v2499_v33  ;;  %v2899_v59 = vld [vmem:[#allocation7 + $0xb4] ss:$8 sps:$4 sm:$0xff]   ;;  %v2900_v60 = vld [vmem:[#allocation7 + $0xc0] ss:$8 sps:$4 sm:$0xff]   ;;  %v2902_v61 = vld [vmem:[#allocation7 + $0xc4] ss:$8 sps:$4 sm:$0xff]  }
  0x45   :  { %337 = vmatprep.mubr.bf16.mxu0 %v3269_v0  ;;  %380 = vmatprep.mubr.bf16.mxu1 %v3269_v0  ;;  %v2903_v62 = vld [vmem:[#allocation7 + $0xd0] ss:$8 sps:$4 sm:$0xff]   ;;  %v2905_v63 = vld [vmem:[#allocation7 + $0xd4] ss:$8 sps:$4 sm:$0xff]   ;;  %v2906_v1 = vld [vmem:[#allocation7 + $0xe0] ss:$8 sps:$4 sm:$0xff]  }
  0x46   :  { %v2908_v2 = vld [vmem:[#allocation7 + $0xe4] ss:$8 sps:$4 sm:$0xff]   ;;  %v2909_v3 = vld [vmem:[#allocation7 + $0xf0] ss:$8 sps:$4 sm:$0xff]   ;;  %v2911_v4 = vld [vmem:[#allocation7 + $0xf4] ss:$8 sps:$4 sm:$0xff]  }
  0x47   :  { %308 = vmatpush1.bf16.msra.mxu0 %v2496_v34  ;;  %351 = vmatpush1.bf16.msra.mxu1 %v2498_v35  ;;  %v2914_v5 = vld [vmem:[#allocation7 + $0x104] ss:$8 sps:$4 sm:$0xff]   ;;  %v3370_v7 = vshrl.u32 %v95_v6, 7 }
  0x48   :  { %564 = vmatprep.subr.bf16.mxu0 %v2866_v37  ;;  %v3393_v19 = vld [vmem:[%s3795_s2] sm:$0xff] }
  0x49   :  { %v113_v11 = vsub.s32 4, %v3370_v7  ;;  %v121_v14 = vsub.s32 6, %v3370_v7  ;;  %v117_v15 = vsub.s32 5, %v3370_v7  ;;  %v125_v18 = vsub.s32 7, %v3370_v7 }
  0x4a   :  { %2502 = vmatmul.mubr.msk.bf16.vlgmr.msra.gmra.mrb[4].mxu0 %vm215_vm0, %v76_v29  ;;  %2503 = vmatmul.mubr.msk.bf16.vlgmr.msra.gmra.mrb[4].mxu1 %vm215_vm0, %v76_v29 }
  0x4b   :  { %596 = vmatprep.mubr.bf16.mxu0 %v3269_v0  ;;  %1556 = vmatprep.mubr.bf16.mxu1 %v3269_v0  ;;  %v114_v21 = vrot.slane %v3393_v19, %v113_v11  ;;  %v122_v22 = vrot.slane %v3393_v19, %v121_v14  ;;  %v118_v23 = vrot.slane %v3393_v19, %v117_v15  ;;  %v3406_v14 = vsub.s32 1, %v3370_v7 }
  0x4c   :  { %565 = vmatpush1.bf16.msra.mxu0 %v2864_v36  ;;  %v126_v24 = vrot.slane %v3393_v19, %v125_v18 }
  0x4d   :  { %566 = vmatprep.subr.bf16.mxu0 %v2869_v38 }
  0x50   :  { %567 = vmatpush1.bf16.msra.mxu0 %v2867_v39 }
  0x51   :  { %568 = vmatprep.subr.bf16.mxu0 %v2872_v40 }
  0x54   :  { %569 = vmatpush1.bf16.msra.mxu0 %v2870_v41 }
  0x55   :  { %570 = vmatprep.subr.bf16.mxu0 %v2875_v42 }
  0x58   :  { %571 = vmatpush1.bf16.msra.mxu0 %v2873_v43 }
  0x59   :  { %572 = vmatprep.subr.bf16.mxu0 %v2878_v44 }
  0x5c   :  { %573 = vmatpush1.bf16.msra.mxu0 %v2876_v45 }
  0x5d   :  { %574 = vmatprep.subr.bf16.mxu0 %v2881_v46 }
  0x60   :  { %575 = vmatpush1.bf16.msra.mxu0 %v2879_v47 }
  0x61   :  { %576 = vmatprep.subr.bf16.mxu0 %v2884_v48 }
  0x64   :  { %577 = vmatpush1.bf16.msra.mxu0 %v2882_v49 }
  0x65   :  { %578 = vmatprep.subr.bf16.mxu0 %v2887_v50 }
  0x68   :  { %579 = vmatpush1.bf16.msra.mxu0 %v2885_v51 }
  0x69   :  { %825 = vmatprep.subr.bf16.mxu0 %v2890_v53 }
  0x6b   :  { %597 = vmatmul.mubr.bf16.vlgmr.msra.gmra.mrb[8].mxu0 %v3269_v0 }
  0x6c   :  { %606 = vmatprep.mubr.bf16.mxu0 %v3269_v0  ;;  %826 = vmatpush1.bf16.msra.mxu0 %v2888_v52 }
  0x6d   :  { %827 = vmatprep.subr.bf16.mxu0 %v2893_v54 }
  0x70   :  { %828 = vmatpush1.bf16.msra.mxu0 %v2891_v55 }
  0x71   :  { %829 = vmatprep.subr.bf16.mxu0 %v2896_v57 }
  0x74   :  { %830 = vmatpush1.bf16.msra.mxu0 %v2894_v56 }
  0x75   :  { %831 = vmatprep.subr.bf16.mxu0 %v2899_v59 }
  0x78   :  { %832 = vmatpush1.bf16.msra.mxu0 %v2897_v58 }
  0x79   :  { %833 = vmatprep.subr.bf16.mxu0 %v2902_v61 }
  0x7c   :  { %834 = vmatpush1.bf16.msra.mxu0 %v2900_v60 }
  0x7d   :  { %835 = vmatprep.subr.bf16.mxu0 %v2905_v63 }
  0x80   :  { %836 = vmatpush1.bf16.msra.mxu0 %v2903_v62 }
  0x81   :  { %837 = vmatprep.subr.bf16.mxu0 %v2908_v2  ;;  %v3402_v2 = vsub.s32 0, %v3370_v7 }
  0x84   :  { %838 = vmatpush1.bf16.msra.mxu0 %v2906_v1 }
  0x85   :  { %839 = vmatprep.subr.bf16.mxu0 %v2911_v4 }
  0x88   :  { %840 = vmatpush1.bf16.msra.mxu0 %v2909_v3 }
  0x89   :  { %1075 = vmatprep.subr.bf16.mxu0 %v2914_v5  ;;  %v105_v5 = vsub.s32 2, %v3370_v7 }
 0x115   :  { %v3372_v8 = vpop.f32.mrb[0].mxu0  ;;  %v3376_v10 = vpop.f32.mrb[0].mxu1 }
 0x116   :  { %v3374_v9 = vpop.f32.mrb[1].mxu0  ;;  %v3381_v13 = vpop.f32.mrb[1].mxu1 }
 0x117   :  { %v3379_v12 = vpop.f32.mrb[2].mxu0  ;;  %v3387_v17 = vpop.f32.mrb[2].mxu1 }
 0x118   :  { %v3385_v16 = vpop.f32.mrb[3].mxu0  ;;  %v3395_v20 = vpop.f32.mrb[3].mxu1 }
 0x11d   :  { %v339_v25 = vpop.f32.mrb[4].mxu0  ;;  %v382_v27 = vpop.f32.mrb[4].mxu1 }
 0x11e   :  { %v340_v26 = vadd.f32 %v339_v25, %v114_v21  ;;  %v341_v28 = vpop.f32.mrb[5].mxu0  ;;  %v383_v29 = vadd.f32 %v382_v27, %v122_v22  ;;  %v384_v31 = vpop.f32.mrb[5].mxu1  ;;  %v106_v25 = vrot.slane %v3393_v19, %v105_v5  ;;  %v2947_v5 = vld [vmem:[#allocation9 + $0x34] ss:$8 sps:$4 sm:$0xff]  }
 0x11f   :  { %v342_v30 = vadd.f32 %v341_v28, %v118_v23  ;;  %v343_v32 = vpop.f32.mrb[6].mxu0  ;;  %v385_v34 = vadd.f32 %v384_v31, %v126_v24  ;;  %v386_v36 = vpop.f32.mrb[6].mxu1 }
 0x120   :  { %v391_v33 = vsub.f32 0.0, %v340_v26  ;;  %v344_v35 = vadd.f32 %v343_v32, %v114_v21  ;;  %v345_v37 = vpop.f32.mrb[7].mxu0  ;;  %v393_v38 = vsub.f32 0.0, %v383_v29  ;;  %v387_v40 = vadd.f32 %v386_v36, %v122_v22  ;;  %v388_v42 = vpop.f32.mrb[7].mxu1 }
 0x121   :  { %v392_v39 = vsub.f32 0.0, %v342_v30  ;;  %v346_v41 = vadd.f32 %v345_v37, %v118_v23  ;;  %v394_v44 = vsub.f32 0.0, %v385_v34  ;;  %v389_v46 = vadd.f32 %v388_v42, %v126_v24 }
 0x122   :  { %v399_v43 = vmul.f32 1.442695, %v391_v33  ;;  %v395_v45 = vsub.f32 0.0, %v344_v35  ;;  %v403_v47 = vmul.f32 1.442695, %v393_v38  ;;  %v397_v49 = vsub.f32 0.0, %v387_v40 }
 0x123   :  { %v401_v48 = vmul.f32 1.442695, %v392_v39  ;;  %v396_v50 = vsub.f32 0.0, %v346_v41  ;;  %v405_v51 = vmul.f32 1.442695, %v394_v44  ;;  %v398_v53 = vsub.f32 0.0, %v389_v46 }
 0x124   :  { %3032 = vpow2.f32 %v399_v43  ;;  %v407_v52 = vmul.f32 1.442695, %v395_v45  ;;  %v411_v54 = vmul.f32 1.442695, %v397_v49  ;;  %v109_v21 = vsub.s32 3, %v3370_v7 }
 0x125   :  { %3034 = vpow2.f32 %v403_v47  ;;  %v409_v55 = vmul.f32 1.442695, %v396_v50  ;;  %v413_v56 = vmul.f32 1.442695, %v398_v53  ;;  %v98_v23 = vrot.slane %v3393_v19, %v3402_v2  ;;  %v2917_v49 = vld [vmem:[#allocation7 + $0x114] ss:$8 sps:$4 sm:$0xff]  }
 0x126   :  { %3036 = vpow2.f32 %v401_v48  ;;  %v102_v26 = vrot.slane %v3393_v19, %v3406_v14  ;;  %v110_v27 = vrot.slane %v3393_v19, %v109_v21  ;;  %v297_v7 = vadd.f32 %v3376_v10, %v106_v25  ;;  %v2912_v48 = vld [vmem:[#allocation7 + $0x100] ss:$8 sps:$4 sm:$0xff]   ;;  %v2915_v50 = vld [vmem:[#allocation7 + $0x110] ss:$8 sps:$4 sm:$0xff]   ;;  %v2923_v53 = vld [vmem:[#allocation7 + $0x134] ss:$8 sps:$4 sm:$0xff]  }
 0x127   :  { %3038 = vpow2.f32 %v405_v51  ;;  %v254_v28 = vadd.f32 %v3372_v8, %v98_v23  ;;  %v258_v37 = vadd.f32 %v3379_v12, %v98_v23  ;;  %v301_v19 = vadd.f32 %v3387_v17, %v106_v25  ;;  %v2920_v51 = vld [vmem:[#allocation7 + $0x124] ss:$8 sps:$4 sm:$0xff]   ;;  %v2951_v21 = vld [vmem:[#allocation9 + $0x50] ss:$8 sps:$4 sm:$0xff]   ;;  %v2954_v23 = vld [vmem:[#allocation9 + $0x60] ss:$8 sps:$4 sm:$0xff]  }
 0x128   :  { %3040 = vpow2.f32 %v407_v52  ;;  %v256_v31 = vadd.f32 %v3374_v9, %v102_v26  ;;  %v299_v34 = vadd.f32 %v3381_v13, %v110_v27  ;;  %v260_v41 = vadd.f32 %v3385_v16, %v102_v26  ;;  %v2938_v16 = vld [vmem:[#allocation9 + $0x4] ss:$8 sps:$4 sm:$0xff]   ;;  %v2918_v52 = vld [vmem:[#allocation7 + $0x120] ss:$8 sps:$4 sm:$0xff]   ;;  %v2957_v25 = vld [vmem:[#allocation9 + $0x70] ss:$8 sps:$4 sm:$0xff]  }
 0x129   :  { %3042 = vpow2.f32 %v411_v54  ;;  %v303_v9 = vadd.f32 %v3395_v20, %v110_v27  ;;  %v2936_v20 = vld [vmem:[#allocation9] ss:$8 sps:$4 sm:$0xff]   ;;  %2616 = vmatprep.subr.bf16.mxu1 %v2938_v16  ;;  %v2921_v54 = vld [vmem:[#allocation7 + $0x130] ss:$8 sps:$4 sm:$0xff]   ;;  %v2962_v26 = vld [vmem:[#allocation9 + $0x84] ss:$8 sps:$4 sm:$0xff]  }
 0x12a   :  { %3044 = vpow2.f32 %v409_v55  ;;  %2624 = vmatpush1.bf16.msra.mxu1 %v2936_v20  ;;  %v2926_v55 = vld [vmem:[#allocation7 + $0x144] ss:$8 sps:$4 sm:$0xff]   ;;  %v459_v27 = vld [vmem:[%s3797_s4] sm:$0x3] }
 0x12b   :  { %3046 = vpow2.f32 %v413_v56  ;;  %v2924_v56 = vld [vmem:[#allocation7 + $0x140] ss:$8 sps:$4 sm:$0xff]  }
 0x12e   :  { %v3033_v57 = vpop.eup %3032 }
 0x12f   :  { %v3035_v58 = vpop.eup %3034  ;;  %v415_v59 = vadd.f32 1.0, %v3033_v57  ;;  %v2929_v57 = vld [vmem:[#allocation7 + $0x154] ss:$8 sps:$4 sm:$0xff]  }
 0x130   :  { %v3037_v60 = vpop.eup %3036  ;;  %v417_v61 = vadd.f32 1.0, %v3035_v58  ;;  %v2927_v58 = vld [vmem:[#allocation7 + $0x150] ss:$8 sps:$4 sm:$0xff]  }
 0x131   :  { %v3039_v62 = vpop.eup %3038  ;;  %3048 = vrcp.f32 %v415_v59  ;;  %v416_v63 = vadd.f32 1.0, %v3037_v60  ;;  %v2932_v59 = vld [vmem:[#allocation7 + $0x164] ss:$8 sps:$4 sm:$0xff]   ;;  %v2930_v60 = vld [vmem:[#allocation7 + $0x160] ss:$8 sps:$4 sm:$0xff]  }
 0x132   :  { %v3041_v1 = vpop.eup %3040  ;;  %3050 = vrcp.f32 %v417_v61  ;;  %v418_v3 = vadd.f32 1.0, %v3039_v62  ;;  %v2935_v61 = vld [vmem:[#allocation7 + $0x174] ss:$8 sps:$4 sm:$0xff]   ;;  %v2933_v62 = vld [vmem:[#allocation7 + $0x170] ss:$8 sps:$4 sm:$0xff]  }
 0x133   :  { %v3043_v4 = vpop.eup %3042  ;;  %3052 = vrcp.f32 %v416_v63  ;;  %v419_v6 = vadd.f32 1.0, %v3041_v1  ;;  %v2941_v63 = vld [vmem:[#allocation9 + $0x14] ss:$8 sps:$4 sm:$0xff]   ;;  %v2939_v1 = vld [vmem:[#allocation9 + $0x10] ss:$8 sps:$4 sm:$0xff]  }
 0x134   :  { %v3045_v11 = vpop.eup %3044  ;;  %3054 = vrcp.f32 %v418_v3  ;;  %v421_v15 = vadd.f32 1.0, %v3043_v4  ;;  %2617 = vmatprep.subr.bf16.mxu1 %v2941_v63  ;;  %v2944_v3 = vld [vmem:[#allocation9 + $0x24] ss:$8 sps:$4 sm:$0xff]   ;;  %v2942_v4 = vld [vmem:[#allocation9 + $0x20] ss:$8 sps:$4 sm:$0xff]  }
 0x135   :  { %v3047_v18 = vpop.eup %3046  ;;  %3056 = vrcp.f32 %v419_v6  ;;  %v420_v22 = vadd.f32 1.0, %v3045_v11  ;;  %2625 = vmatpush1.bf16.msra.mxu1 %v2939_v1  ;;  %v2945_v6 = vld [vmem:[#allocation9 + $0x30] ss:$8 sps:$4 sm:$0xff]   ;;  %v2950_v11 = vld [vmem:[#allocation9 + $0x44] ss:$8 sps:$4 sm:$0xff]  }
 0x136   :  { %3058 = vrcp.f32 %v421_v15  ;;  %v422_v24 = vadd.f32 1.0, %v3047_v18  ;;  %2618 = vmatprep.subr.bf16.mxu1 %v2944_v3  ;;  %v2948_v15 = vld [vmem:[#allocation9 + $0x40] ss:$8 sps:$4 sm:$0xff]   ;;  %v2953_v18 = vld [vmem:[#allocation9 + $0x54] ss:$8 sps:$4 sm:$0xff]  }
 0x137   :  { %3060 = vrcp.f32 %v420_v22  ;;  %v2956_v22 = vld [vmem:[#allocation9 + $0x64] ss:$8 sps:$4 sm:$0xff]  }
 0x138   :  { %3062 = vrcp.f32 %v422_v24  ;;  %v2959_v24 = vld [vmem:[#allocation9 + $0x74] ss:$8 sps:$4 sm:$0xff]  }
 0x139   :  { %2626 = vmatpush1.bf16.msra.mxu1 %v2942_v4 }
 0x13a   :  { %2619 = vmatprep.subr.bf16.mxu1 %v2947_v5 }
 0x13b   :  { %v3049_v29 = vpop.eup %3048 }
 0x13c   :  { %v3051_v30 = vpop.eup %3050  ;;  %v431_v32 = vmul.f32 %v3049_v29, %v254_v28  ;;  %v3483_v28 = vrot.slane %v459_v27, %v3406_v14 }
 0x13d   :  { %v3053_v33 = vpop.eup %3052  ;;  %v433_v35 = vmul.f32 %v3051_v30, %v297_v7  ;;  %2627 = vmatpush1.bf16.msra.mxu1 %v2945_v6 }
 0x13e   :  { %v3055_v36 = vpop.eup %3054  ;;  %v432_v38 = vmul.f32 %v3053_v33, %v256_v31  ;;  %2620 = vmatprep.subr.bf16.mxu1 %v2950_v11 }
 0x13f   :  { %v3057_v39 = vpop.eup %3056  ;;  %v434_v40 = vmul.f32 %v3055_v36, %v299_v34 }
 0x140   :  { %v3059_v8 = vpop.eup %3058  ;;  %v435_v10 = vmul.f32 %v3057_v39, %v258_v37 }
 0x141   :  { %v3061_v42 = vpop.eup %3060  ;;  %v437_v43 = vmul.f32 %v3059_v8, %v301_v19  ;;  %2628 = vmatpush1.bf16.msra.mxu1 %v2948_v15 }
 0x142   :  { %v3063_v44 = vpop.eup %3062  ;;  %v436_v45 = vmul.f32 %v3061_v42, %v260_v41  ;;  %v3423_v13 = vpack.c.bf16 %v435_v10, %v431_v32  ;;  %2621 = vmatprep.subr.bf16.mxu1 %v2953_v18 }
 0x143   :  { %v3425_v46 = vpack.c.bf16 %v437_v43, %v433_v35  ;;  %v438_v12 = vmul.f32 %v3063_v44, %v303_v9 }
 0x144   :  { %607 = vmatmul.mubr.bf16.gmra.mrb[12].mxu0 %v3423_v13  ;;  %v3428_v47 = vpack.c.bf16 %v436_v45, %v432_v38 }
 0x145   :  { %616 = vmatprep.mubr.bf16.mxu0 %v3269_v0  ;;  %v3431_v17 = vpack.c.bf16 %v438_v12, %v434_v40  ;;  %2629 = vmatpush1.bf16.msra.mxu1 %v2951_v21 }
 0x146   :  { %2622 = vmatprep.subr.bf16.mxu1 %v2956_v22 }
 0x149   :  { %2630 = vmatpush1.bf16.msra.mxu1 %v2954_v23 }
 0x14a   :  { %2623 = vmatprep.subr.bf16.mxu1 %v2959_v24 }
 0x14c   :  { %617 = vmatmul.mubr.bf16.gmra.mrb[16].mxu0 %v3423_v13 }
 0x14d   :  { %626 = vmatprep.mubr.bf16.mxu0 %v3269_v0  ;;  %2631 = vmatpush1.bf16.msra.mxu1 %v2957_v25 }
 0x14e   :  { %1737 = vmatprep.subr.bf16.mxu1 %v2962_v26 }
 0x154   :  { %627 = vmatmul.mubr.bf16.gmra.mrb[20].mxu0 %v3428_v47 }
 0x155   :  { %636 = vmatprep.mubr.bf16.mxu0 %v3269_v0 }
 0x15c   :  { %637 = vmatmul.mubr.bf16.gmra.mrb[24].mxu0 %v3428_v47 }
 0x15d   :  { %646 = vmatprep.mubr.bf16.mxu0 %v3269_v0 }
 0x164   :  { %647 = vmatmul.mubr.bf16.gmra.mrb[28].mxu0 %v3425_v46 }
 0x165   :  { %656 = vmatprep.mubr.bf16.mxu0 %v3269_v0 }
 0x16c   :  { %657 = vmatmul.mubr.bf16.gmra.mrb[32].mxu0 %v3425_v46 }
 0x16d   :  { %666 = vmatprep.mubr.bf16.mxu0 %v3269_v0 }
 0x174   :  { %667 = vmatmul.mubr.bf16.gmra.mrb[36].mxu0 %v3431_v17 }
 0x175   :  { %857 = vmatprep.mubr.bf16.mxu0 %v3269_v0 }
 0x17c   :  { %858 = vmatmul.mubr.bf16.vlgmr.msra.gmra.mrb[8].mxu0 %v3423_v13 }
 0x17d   :  { %1076 = vmatpush1.bf16.msra.mxu0 %v2912_v48  ;;  %867 = vmatprep.mubr.bf16.mxu0 %v3269_v0 }
 0x17e   :  { %1077 = vmatprep.subr.bf16.mxu0 %v2917_v49 }
 0x181   :  { %1078 = vmatpush1.bf16.msra.mxu0 %v2915_v50 }
 0x182   :  { %1079 = vmatprep.subr.bf16.mxu0 %v2920_v51 }
 0x184   :  { %868 = vmatmul.mubr.bf16.gmra.mrb[12].mxu0 %v3423_v13 }
 0x185   :  { %877 = vmatprep.mubr.bf16.mxu0 %v3269_v0  ;;  %1080 = vmatpush1.bf16.msra.mxu0 %v2918_v52 }
 0x186   :  { %1081 = vmatprep.subr.bf16.mxu0 %v2923_v53 }
 0x189   :  { %1082 = vmatpush1.bf16.msra.mxu0 %v2921_v54 }
 0x18a   :  { %1083 = vmatprep.subr.bf16.mxu0 %v2926_v55 }
 0x18c   :  { %878 = vmatmul.mubr.bf16.gmra.mrb[16].mxu0 %v3428_v47 }
 0x18d   :  { %887 = vmatprep.mubr.bf16.mxu0 %v3269_v0  ;;  %1084 = vmatpush1.bf16.msra.mxu0 %v2924_v56  ;;  %v3502_v56 = vrot.slane %v459_v27, %v3402_v2 }
 0x18e   :  { %1085 = vmatprep.subr.bf16.mxu0 %v2929_v57 }
 0x191   :  { %1086 = vmatpush1.bf16.msra.mxu0 %v2927_v58 }
 0x192   :  { %1087 = vmatprep.subr.bf16.mxu0 %v2932_v59 }
 0x194   :  { %888 = vmatmul.mubr.bf16.gmra.mrb[20].mxu0 %v3428_v47 }
 0x195   :  { %897 = vmatprep.mubr.bf16.mxu0 %v3269_v0  ;;  %1088 = vmatpush1.bf16.msra.mxu0 %v2930_v60 }
 0x196   :  { %1089 = vmatprep.subr.bf16.mxu0 %v2935_v61 }
 0x199   :  { %1090 = vmatpush1.bf16.msra.mxu0 %v2933_v62 }
 0x19a   :  { %1484 = vmatprep.subr.bf16.mxu0 %v2938_v16 }
 0x19c   :  { %898 = vmatmul.mubr.bf16.gmra.mrb[24].mxu0 %v3425_v46 }
 0x19d   :  { %907 = vmatprep.mubr.bf16.mxu0 %v3269_v0 }
 0x1a4   :  { %908 = vmatmul.mubr.bf16.gmra.mrb[28].mxu0 %v3425_v46 }
 0x1a5   :  { %917 = vmatprep.mubr.bf16.mxu0 %v3269_v0 }
 0x1ac   :  { %918 = vmatmul.mubr.bf16.gmra.mrb[32].mxu0 %v3431_v17 }
 0x1ad   :  { %927 = vmatprep.mubr.bf16.mxu0 %v3269_v0 }
 0x1b4   :  { %928 = vmatmul.mubr.bf16.gmra.mrb[36].mxu0 %v3431_v17 }
 0x1b5   :  { %1107 = vmatprep.mubr.bf16.mxu0 %v3269_v0 }
 0x1bc   :  { %1108 = vmatmul.mubr.bf16.vlgmr.msra.gmra.mrb[8].mxu0 %v3423_v13 }
 0x1bd   :  { %1117 = vmatprep.mubr.bf16.mxu0 %v3269_v0  ;;  %1485 = vmatpush1.bf16.msra.mxu0 %v2936_v20 }
 0x1be   :  { %1486 = vmatprep.subr.bf16.mxu0 %v2941_v63 }
 0x1c1   :  { %1487 = vmatpush1.bf16.msra.mxu0 %v2939_v1 }
 0x1c2   :  { %1488 = vmatprep.subr.bf16.mxu0 %v2944_v3 }
 0x1c4   :  { %1118 = vmatmul.mubr.bf16.gmra.mrb[12].mxu0 %v3428_v47 }
 0x1c5   :  { %1127 = vmatprep.mubr.bf16.mxu0 %v3269_v0  ;;  %1489 = vmatpush1.bf16.msra.mxu0 %v2942_v4 }
 0x1c6   :  { %1490 = vmatprep.subr.bf16.mxu0 %v2947_v5 }
 0x1c9   :  { %1491 = vmatpush1.bf16.msra.mxu0 %v2945_v6 }
 0x1ca   :  { %1492 = vmatprep.subr.bf16.mxu0 %v2950_v11 }
 0x1cc   :  { %1128 = vmatmul.mubr.bf16.gmra.mrb[16].mxu0 %v3428_v47 }
 0x1cd   :  { %1137 = vmatprep.mubr.bf16.mxu0 %v3269_v0  ;;  %1493 = vmatpush1.bf16.msra.mxu0 %v2948_v15 }
 0x1ce   :  { %1494 = vmatprep.subr.bf16.mxu0 %v2953_v18 }
 0x1d1   :  { %1495 = vmatpush1.bf16.msra.mxu0 %v2951_v21 }
 0x1d2   :  { %1496 = vmatprep.subr.bf16.mxu0 %v2956_v22 }
 0x1d4   :  { %1138 = vmatmul.mubr.bf16.gmra.mrb[20].mxu0 %v3425_v46 }
 0x1d5   :  { %1147 = vmatprep.mubr.bf16.mxu0 %v3269_v0  ;;  %1497 = vmatpush1.bf16.msra.mxu0 %v2954_v23 }
 0x1d6   :  { %1498 = vmatprep.subr.bf16.mxu0 %v2959_v24 }
 0x1d9   :  { %1499 = vmatpush1.bf16.msra.mxu0 %v2957_v25 }
 0x1dc   :  { %1148 = vmatmul.mubr.bf16.gmra.mrb[24].mxu0 %v3425_v46 }
 0x1dd   :  { %1157 = vmatprep.mubr.bf16.mxu0 %v3269_v0 }
 0x1e4   :  { %1158 = vmatmul.mubr.bf16.gmra.mrb[28].mxu0 %v3431_v17 }
 0x1e5   :  { %1167 = vmatprep.mubr.bf16.mxu0 %v3269_v0 }
 0x1ec   :  { %1168 = vmatmul.mubr.bf16.gmra.mrb[32].mxu0 %v3431_v17 }
 0x1ed   :  { %1177 = vmatprep.mubr.bf16.mxu0 %v3269_v0 }
 0x1f4   :  { %1178 = vmatmul.mubr.bf16.gmra.mrb[36].mxu0 %v3269_v0 }
 0x1f5   :  { %1516 = vmatprep.mubr.bf16.mxu0 %v3269_v0 }
 0x1fc   :  { %1517 = vmatmul.mubr.bf16.vlgmr.msra.gmra.mrb[40].mxu0 %v3269_v0 }
 0x1fd   :  { %1526 = vmatprep.mubr.bf16.mxu0 %v3269_v0 }
 0x28f   :  { %v1109_v29 = vpop.f32.mrb[8].mxu0 }
 0x290   :  { %v1111_v7 = vpop.f32.mrb[9].mxu0  ;;  %v2632_v3 = vadd.f32 %v1109_v29, %v3502_v56 }
 0x291   :  { %v2633_v30 = vadd.f32 %v1111_v7, %v3483_v28  ;;  %v1113_v31 = vpop.f32.mrb[10].mxu0 }
 0x292   :  { %v1115_v32 = vpop.f32.mrb[11].mxu0  ;;  %v2634_v11 = vadd.f32 %v1113_v31, %v3502_v56 }
 0x293   :  { %v1220_v33 = vsub.f32 0.0, %v2633_v30  ;;  %v2635_v34 = vadd.f32 %v1115_v32, %v3483_v28 }
 0x295   :  { %v1236_v35 = vmul.f32 1.442695, %v1220_v33  ;;  %v1221_v36 = vsub.f32 0.0, %v2635_v34 }
 0x297   :  { %3064 = vpow2.f32 %v1236_v35  ;;  %v1238_v37 = vmul.f32 1.442695, %v1221_v36  ;;  %v3487_v38 = vpop.f32.mrb[12].mxu0 }
 0x298   :  { %v1121_v39 = vpop.f32.mrb[13].mxu0  ;;  %v2636_v35 = vadd.f32 %v3487_v38, %v3502_v56 }
 0x299   :  { %3066 = vpow2.f32 %v1238_v37  ;;  %v2637_v19 = vadd.f32 %v1121_v39, %v3483_v28  ;;  %v3490_v40 = vpop.f32.mrb[14].mxu0 }
 0x29a   :  { %v1125_v8 = vpop.f32.mrb[15].mxu0 }
 0x29b   :  { %v1222_v41 = vsub.f32 0.0, %v2637_v19  ;;  %v2639_v10 = vadd.f32 %v1125_v8, %v3483_v28  ;;  %v2638_v19 = vadd.f32 %v3490_v40, %v3502_v56 }
 0x29d   :  { %v1240_v42 = vmul.f32 1.442695, %v1222_v41  ;;  %v1223_v9 = vsub.f32 0.0, %v2639_v10 }
 0x29f   :  { %3068 = vpow2.f32 %v1240_v42  ;;  %v1242_v43 = vmul.f32 1.442695, %v1223_v9  ;;  %v3493_v44 = vpop.f32.mrb[16].mxu0 }
 0x2a0   :  { %v1131_v45 = vpop.f32.mrb[17].mxu0 }
 0x2a1   :  { %v3065_v13 = vpop.eup %3064  ;;  %3070 = vpow2.f32 %v1242_v43  ;;  %v2641_v46 = vadd.f32 %v1131_v45, %v3483_v28  ;;  %v3496_v12 = vpop.f32.mrb[18].mxu0 }
 0x2a2   :  { %v1268_v47 = vadd.f32 1.0, %v3065_v13  ;;  %v1135_v17 = vpop.f32.mrb[19].mxu0 }
 0x2a3   :  { %v3067_v16 = vpop.eup %3066  ;;  %v1224_v20 = vsub.f32 0.0, %v2641_v46  ;;  %v2643_v48 = vadd.f32 %v1135_v17, %v3483_v28 }
 0x2a4   :  { %3072 = vrcp.f32 %v1268_v47  ;;  %v1269_v49 = vadd.f32 1.0, %v3067_v16 }
 0x2a5   :  { %v1244_v50 = vmul.f32 1.442695, %v1224_v20  ;;  %v1225_v51 = vsub.f32 0.0, %v2643_v48 }
 0x2a6   :  { %3074 = vrcp.f32 %v1269_v49  ;;  %v2640_v49 = vadd.f32 %v3493_v44, %v3502_v56 }
 0x2a7   :  { %3076 = vpow2.f32 %v1244_v50  ;;  %v1246_v52 = vmul.f32 1.442695, %v1225_v51  ;;  %v3499_v53 = vpop.f32.mrb[20].mxu0 }
 0x2a8   :  { %v1141_v54 = vpop.f32.mrb[21].mxu0 }
 0x2a9   :  { %v3069_v55 = vpop.eup %3068  ;;  %3078 = vpow2.f32 %v1246_v52  ;;  %v2645_v57 = vadd.f32 %v1141_v54, %v3483_v28  ;;  %v3505_v58 = vpop.f32.mrb[22].mxu0  ;;  %v2642_v54 = vadd.f32 %v3496_v12, %v3502_v56 }
 0x2aa   :  { %v1270_v59 = vadd.f32 1.0, %v3069_v55  ;;  %v1145_v60 = vpop.f32.mrb[23].mxu0 }
 0x2ab   :  { %v3071_v61 = vpop.eup %3070  ;;  %v1226_v62 = vsub.f32 0.0, %v2645_v57  ;;  %v2647_v63 = vadd.f32 %v1145_v60, %v3483_v28 }
 0x2ac   :  { %3080 = vrcp.f32 %v1270_v59  ;;  %v1271_v1 = vadd.f32 1.0, %v3071_v61 }
 0x2ad   :  { %v1248_v4 = vmul.f32 1.442695, %v1226_v62  ;;  %v1227_v5 = vsub.f32 0.0, %v2647_v63 }
 0x2ae   :  { %v3073_v6 = vpop.eup %3072  ;;  %3082 = vrcp.f32 %v1271_v1 }
 0x2af   :  { %3084 = vpow2.f32 %v1248_v4  ;;  %v1250_v15 = vmul.f32 1.442695, %v1227_v5  ;;  %v3510_v18 = vpop.f32.mrb[24].mxu0  ;;  %v1300_v21 = vmul.f32 %v3073_v6, %v2632_v3 }
 0x2b0   :  { %v3075_v22 = vpop.eup %3074  ;;  %v1151_v23 = vpop.f32.mrb[25].mxu0 }
 0x2b1   :  { %v3077_v24 = vpop.eup %3076  ;;  %3086 = vpow2.f32 %v1250_v15  ;;  %v2649_v25 = vadd.f32 %v1151_v23, %v3483_v28  ;;  %v3513_v26 = vpop.f32.mrb[26].mxu0  ;;  %v1301_v27 = vmul.f32 %v3075_v22, %v2634_v11 }
 0x2b2   :  { %v1272_v29 = vadd.f32 1.0, %v3077_v24  ;;  %v1155_v7 = vpop.f32.mrb[27].mxu0 }
 0x2b3   :  { %v3079_v30 = vpop.eup %3078  ;;  %v1228_v32 = vsub.f32 0.0, %v2649_v25  ;;  %v2651_v31 = vadd.f32 %v1155_v7, %v3483_v28  ;;  %v3516_v33 = vpack.c.bf16 %v1301_v27, %v1300_v21  ;;  %v2644_v21 = vadd.f32 %v3499_v53, %v3502_v56 }
 0x2b4   :  { %3088 = vrcp.f32 %v1272_v29  ;;  %v1273_v34 = vadd.f32 1.0, %v3079_v30  ;;  %v2646_v25 = vadd.f32 %v3505_v58, %v3502_v56 }
 0x2b5   :  { %v1252_v36 = vmul.f32 1.442695, %v1228_v32  ;;  %v1229_v37 = vsub.f32 0.0, %v2651_v31  ;;  %1527 = vmatmul.mubr.bf16.gmra.mrb[44].mxu0 %v3516_v33 }
 0x2b6   :  { %v3081_v39 = vpop.eup %3080  ;;  %3090 = vrcp.f32 %v1273_v34  ;;  %1536 = vmatprep.mubr.bf16.mxu0 %v3269_v0 }
 0x2b7   :  { %3092 = vpow2.f32 %v1252_v36  ;;  %v1254_v8 = vmul.f32 1.442695, %v1229_v37  ;;  %v3524_v41 = vpop.f32.mrb[28].mxu0  ;;  %v1302_v10 = vmul.f32 %v3081_v39, %v2636_v35 }
 0x2b8   :  { %v3083_v42 = vpop.eup %3082  ;;  %v1161_v9 = vpop.f32.mrb[29].mxu0 }
 0x2b9   :  { %v3085_v43 = vpop.eup %3084  ;;  %3094 = vpow2.f32 %v1254_v8  ;;  %v2653_v38 = vadd.f32 %v1161_v9, %v3483_v28  ;;  %v3527_v45 = vpop.f32.mrb[30].mxu0  ;;  %v1303_v13 = vmul.f32 %v3083_v42, %v2638_v19  ;;  %v2960_v19 = vld [vmem:[#allocation9 + $0x80] ss:$8 sps:$4 sm:$0xff]  }
 0x2ba   :  { %v1274_v46 = vadd.f32 1.0, %v3085_v43  ;;  %v1165_v47 = vpop.f32.mrb[31].mxu0  ;;  %v2965_v43 = vld [vmem:[#allocation9 + $0x94] ss:$8 sps:$4 sm:$0xff]  }
 0x2bb   :  { %v3087_v17 = vpop.eup %3086  ;;  %v1230_v16 = vsub.f32 0.0, %v2653_v38  ;;  %v2655_v40 = vadd.f32 %v1165_v47, %v3483_v28  ;;  %v3530_v20 = vpack.c.bf16 %v1303_v13, %v1302_v10  ;;  %v2648_v13 = vadd.f32 %v3510_v18, %v3502_v56 }
 0x2bc   :  { %3096 = vrcp.f32 %v1274_v46  ;;  %v1275_v48 = vadd.f32 1.0, %v3087_v17 }
 0x2bd   :  { %v1256_v50 = vmul.f32 1.442695, %v1230_v16  ;;  %v1231_v51 = vsub.f32 0.0, %v2655_v40  ;;  %1537 = vmatmul.mubr.bf16.gmra.mrb[48].mxu0 %v3530_v20  ;;  %v2963_v16 = vld [vmem:[#allocation9 + $0x90] ss:$8 sps:$4 sm:$0xff]  }
 0x2be   :  { %v3089_v52 = vpop.eup %3088  ;;  %3098 = vrcp.f32 %v1275_v48  ;;  %1546 = vmatprep.mubr.bf16.mxu0 %v3269_v0 }
 0x2bf   :  { %3100 = vpow2.f32 %v1256_v50  ;;  %v1258_v55 = vmul.f32 1.442695, %v1231_v51  ;;  %v3538_v57 = vpop.f32.mrb[32].mxu0  ;;  %v1304_v59 = vmul.f32 %v3089_v52, %v2640_v49  ;;  %v2968_v49 = vld [vmem:[#allocation9 + $0xa4] ss:$8 sps:$4 sm:$0xff]  }
 0x2c0   :  { %v3091_v60 = vpop.eup %3090  ;;  %v1171_v61 = vpop.f32.mrb[33].mxu0 }
 0x2c1   :  { %v3093_v62 = vpop.eup %3092  ;;  %3102 = vpow2.f32 %v1258_v55  ;;  %v2657_v44 = vadd.f32 %v1171_v61, %v3483_v28  ;;  %v3541_v63 = vpop.f32.mrb[34].mxu0  ;;  %v1305_v1 = vmul.f32 %v3091_v60, %v2642_v54  ;;  %v2966_v54 = vld [vmem:[#allocation9 + $0xa0] ss:$8 sps:$4 sm:$0xff]   ;;  %v2971_v60 = vld [vmem:[#allocation9 + $0xb4] ss:$8 sps:$4 sm:$0xff]  }
 0x2c2   :  { %v1276_v3 = vadd.f32 1.0, %v3093_v62  ;;  %v1175_v4 = vpop.f32.mrb[35].mxu0 }
 0x2c3   :  { %v3095_v5 = vpop.eup %3094  ;;  %v1232_v6 = vsub.f32 0.0, %v2657_v44  ;;  %v2659_v12 = vadd.f32 %v1175_v4, %v3483_v28  ;;  %v3544_v11 = vpack.c.bf16 %v1305_v1, %v1304_v59  ;;  %v2969_v44 = vld [vmem:[#allocation9 + $0xb0] ss:$8 sps:$4 sm:$0xff]   ;;  %v2654_v1 = vadd.f32 %v3527_v45, %v3502_v56  ;;  %v2974_v4 = vld [vmem:[#allocation9 + $0xc4] ss:$8 sps:$4 sm:$0xff]  }
 0x2c4   :  { %3104 = vrcp.f32 %v1276_v3  ;;  %v1277_v15 = vadd.f32 1.0, %v3095_v5 }
 0x2c5   :  { %v1260_v22 = vmul.f32 1.442695, %v1232_v6  ;;  %v1233_v23 = vsub.f32 0.0, %v2659_v12  ;;  %1547 = vmatmul.mubr.bf16.gmra.mrb[52].mxu0 %v3544_v11 }
 0x2c6   :  { %v3097_v24 = vpop.eup %3096  ;;  %3106 = vrcp.f32 %v1277_v15 }
 0x2c7   :  { %3108 = vpow2.f32 %v1260_v22  ;;  %v1262_v27 = vmul.f32 1.442695, %v1233_v23  ;;  %v1179_v29 = vpop.f32.mrb[36].mxu0  ;;  %v1306_v7 = vmul.f32 %v3097_v24, %v2644_v21  ;;  %v2977_v23 = vld [vmem:[#allocation9 + $0xd4] ss:$8 sps:$4 sm:$0xff]  }
 0x2c8   :  { %v3099_v30 = vpop.eup %3098  ;;  %v3552_v32 = vadd.f32 %v1179_v29, %v3502_v56  ;;  %v1181_v31 = vpop.f32.mrb[37].mxu0  ;;  %v2658_v29 = vadd.f32 %v3541_v63, %v3502_v56 }
 0x2c9   :  { %v3101_v34 = vpop.eup %3100  ;;  %3110 = vpow2.f32 %v1262_v27  ;;  %v2661_v53 = vadd.f32 %v1181_v31, %v3483_v28  ;;  %v1183_v35 = vpop.f32.mrb[38].mxu0  ;;  %v1307_v36 = vmul.f32 %v3099_v30, %v2646_v25  ;;  %v2656_v25 = vadd.f32 %v3538_v57, %v3502_v56  ;;  %v2975_v27 = vld [vmem:[#allocation9 + $0xd0] ss:$8 sps:$4 sm:$0xff]   ;;  %v2980_v30 = vld [vmem:[#allocation9 + $0xe4] ss:$8 sps:$4 sm:$0xff]  }
 0x2ca   :  { %v1278_v37 = vadd.f32 1.0, %v3101_v34  ;;  %v3556_v39 = vadd.f32 %v1183_v35, %v3502_v56  ;;  %v1185_v58 = vpop.f32.mrb[39].mxu0  ;;  %v2983_v57 = vld [vmem:[#allocation9 + $0xf4] ss:$8 sps:$4 sm:$0xff]  }
 0x2cb   :  { %v3103_v8 = vpop.eup %3102  ;;  %v1234_v10 = vsub.f32 0.0, %v2661_v53  ;;  %v2663_v42 = vadd.f32 %v1185_v58, %v3483_v28  ;;  %v3559_v9 = vpack.c.bf16 %v1307_v36, %v1306_v7  ;;  %v2650_v28 = vadd.f32 %v3513_v26, %v3502_v56  ;;  %v2978_v53 = vld [vmem:[#allocation9 + $0xe0] ss:$8 sps:$4 sm:$0xff]  }
 0x2cc   :  { %3112 = vrcp.f32 %v1278_v37  ;;  %v1279_v38 = vadd.f32 1.0, %v3103_v8  ;;  %v2652_v26 = vadd.f32 %v3524_v41, %v3502_v56  ;;  %v2972_v41 = vld [vmem:[#allocation9 + $0xc0] ss:$8 sps:$4 sm:$0xff]   ;;  %v2981_v37 = vld [vmem:[#allocation9 + $0xf0] ss:$8 sps:$4 sm:$0xff]  }
 0x2cd   :  { %v1264_v46 = vmul.f32 1.442695, %v1234_v10  ;;  %v1235_v47 = vsub.f32 0.0, %v2663_v42  ;;  %1557 = vmatmul.mubr.bf16.vlgmr.msra.gmra.mrb[8].mxu1 %v3559_v9  ;;  %v2986_v56 = vld [vmem:[#allocation9 + $0x104] ss:$8 sps:$4 sm:$0xff]  }
 0x2ce   :  { %v3105_v17 = vpop.eup %3104  ;;  %3114 = vrcp.f32 %v1279_v38  ;;  %1738 = vmatpush1.bf16.msra.mxu1 %v2960_v19  ;;  %1566 = vmatprep.mubr.bf16.mxu1 %v3269_v0  ;;  %v2984_v8 = vld [vmem:[#allocation9 + $0x100] ss:$8 sps:$4 sm:$0xff]   ;;  %v2989_v10 = vld [vmem:[#allocation9 + $0x114] ss:$8 sps:$4 sm:$0xff]   ;;  %v2992_v38 = vld [vmem:[#allocation9 + $0x124] ss:$8 sps:$4 sm:$0xff]  }
 0x2cf   :  { %3116 = vpow2.f32 %v1264_v46  ;;  %v1266_v40 = vmul.f32 1.442695, %v1235_v47  ;;  %1739 = vmatprep.subr.bf16.mxu1 %v2965_v43  ;;  %v1308_v48 = vmul.f32 %v3105_v17, %v2648_v13  ;;  %v2987_v43 = vld [vmem:[#allocation9 + $0x110] ss:$8 sps:$4 sm:$0xff]   ;;  %v2990_v13 = vld [vmem:[#allocation9 + $0x120] ss:$8 sps:$4 sm:$0xff]  }
 0x2d0   :  { %v3107_v50 = vpop.eup %3106  ;;  %v2998_v46 = vld [vmem:[#allocation9 + $0x144] ss:$8 sps:$4 sm:$0xff]   ;;  %v2996_v47 = vld [vmem:[#allocation9 + $0x140] ss:$8 sps:$4 sm:$0xff]   ;;  %v3001_v17 = vld [vmem:[#allocation9 + $0x154] ss:$8 sps:$4 sm:$0xff]  }
 0x2d1   :  { %v3109_v18 = vpop.eup %3108  ;;  %3118 = vpow2.f32 %v1266_v40  ;;  %v1309_v51 = vmul.f32 %v3107_v50, %v2650_v28  ;;  %v3004_v28 = vld [vmem:[#allocation9 + $0x164] ss:$8 sps:$4 sm:$0xff]   ;;  %v3002_v40 = vld [vmem:[#allocation9 + $0x160] ss:$8 sps:$4 sm:$0xff]  }
 0x2d2   :  { %v1280_v52 = vadd.f32 1.0, %v3109_v18  ;;  %1740 = vmatpush1.bf16.msra.mxu1 %v2963_v16  ;;  %v2999_v16 = vld [vmem:[#allocation9 + $0x150] ss:$8 sps:$4 sm:$0xff]  }
 0x2d3   :  { %v3111_v55 = vpop.eup %3110  ;;  %v3567_v59 = vpack.c.bf16 %v1309_v51, %v1308_v48  ;;  %1741 = vmatprep.subr.bf16.mxu1 %v2968_v49  ;;  %v3597_v48 = vpop.f32.mrb[40].mxu0  ;;  %v3007_v49 = vld [vmem:[#allocation9 + $0x174] ss:$8 sps:$4 sm:$0xff]   ;;  %v3005_v51 = vld [vmem:[#allocation9 + $0x170] ss:$8 sps:$4 sm:$0xff]  }
 0x2d4   :  { %3120 = vrcp.f32 %v1280_v52  ;;  %v1281_v61 = vadd.f32 1.0, %v3111_v55  ;;  %v3599_v50 = vpop.f32.mrb[41].mxu0  ;;  %v3008_v55 = vld [vmem:[#allocation9 + $0x180] ss:$8 sps:$4 sm:$0xff]  }
 0x2d5   :  { %1567 = vmatmul.mubr.bf16.gmra.mrb[12].mxu1 %v3567_v59  ;;  %v3602_v18 = vpop.f32.mrb[42].mxu0 }
 0x2d6   :  { %v3113_v62 = vpop.eup %3112  ;;  %3122 = vrcp.f32 %v1281_v61  ;;  %1742 = vmatpush1.bf16.msra.mxu1 %v2966_v54  ;;  %1576 = vmatprep.mubr.bf16.mxu1 %v3269_v0  ;;  %v3605_v52 = vpop.f32.mrb[43].mxu0  ;;  %v3010_v54 = vld [vmem:[#allocation9 + $0x184] ss:$8 sps:$4 sm:$0xff]   ;;  %v3011_v61 = vld [vmem:[#allocation9 + $0x190] ss:$8 sps:$4 sm:$0xff]  }
 0x2d7   :  { %1743 = vmatprep.subr.bf16.mxu1 %v2971_v60  ;;  %v1310_v3 = vmul.f32 %v3113_v62, %v2652_v26  ;;  %v3013_v60 = vld [vmem:[#allocation9 + $0x194] ss:$8 sps:$4 sm:$0xff]   ;;  %v3016_v26 = vld [vmem:[#allocation9 + $0x1a4] ss:$8 sps:$4 sm:$0xff]   ;;  %v3014_v62 = vld [vmem:[#allocation9 + $0x1a0] ss:$8 sps:$4 sm:$0xff]  }
 0x2d8   :  { %v3115_v5 = vpop.eup %3114 }
 0x2d9   :  { %v3117_v6 = vpop.eup %3116  ;;  %v1311_v12 = vmul.f32 %v3115_v5, %v2654_v1  ;;  %v3017_v1 = vld [vmem:[#allocation9 + $0x1b0] ss:$8 sps:$4 sm:$0xff]  }
 0x2da   :  { %v1282_v15 = vadd.f32 1.0, %v3117_v6  ;;  %1744 = vmatpush1.bf16.msra.mxu1 %v2969_v44  ;;  %v3019_v44 = vld [vmem:[#allocation9 + $0x1b4] ss:$8 sps:$4 sm:$0xff]   ;;  %v3023_v5 = vld [vmem:[#allocation9 + $0x1d0] ss:$8 sps:$4 sm:$0xff]  }
 0x2db   :  { %v3119_v21 = vpop.eup %3118  ;;  %v3575_v22 = vpack.c.bf16 %v1311_v12, %v1310_v3  ;;  %1745 = vmatprep.subr.bf16.mxu1 %v2974_v4  ;;  %v3022_v3 = vld [vmem:[#allocation9 + $0x1c4] ss:$8 sps:$4 sm:$0xff]   ;;  %v3025_v4 = vld [vmem:[#allocation9 + $0x1d4] ss:$8 sps:$4 sm:$0xff]   ;;  %v3026_v12 = vld [vmem:[#allocation9 + $0x1e0] ss:$8 sps:$4 sm:$0xff]  }
 0x2dc   :  { %3124 = vrcp.f32 %v1282_v15  ;;  %v1283_v24 = vadd.f32 1.0, %v3119_v21  ;;  %v3028_v6 = vld [vmem:[#allocation9 + $0x1e4] ss:$8 sps:$4 sm:$0xff]   ;;  %v3031_v15 = vld [vmem:[#allocation9 + $0x1f4] ss:$8 sps:$4 sm:$0xff]  }
 0x2dd   :  { %1577 = vmatmul.mubr.bf16.gmra.mrb[16].mxu1 %v3575_v22 }
 0x2de   :  { %v3121_v45 = vpop.eup %3120  ;;  %3126 = vrcp.f32 %v1283_v24  ;;  %1746 = vmatpush1.bf16.msra.mxu1 %v2972_v41  ;;  %1586 = vmatprep.mubr.bf16.mxu1 %v3269_v0  ;;  %v3029_v41 = vld [vmem:[#allocation9 + $0x1f0] ss:$8 sps:$4 sm:$0xff]  }
 0x2df   :  { %1747 = vmatprep.subr.bf16.mxu1 %v2977_v23  ;;  %v1312_v7 = vmul.f32 %v3121_v45, %v2656_v25 }
 0x2e0   :  { %v3123_v31 = vpop.eup %3122 }
 0x2e1   :  { %v1313_v34 = vmul.f32 %v3123_v31, %v2658_v29 }
 0x2e2   :  { %1748 = vmatpush1.bf16.msra.mxu1 %v2975_v27 }
 0x2e3   :  { %v3583_v35 = vpack.c.bf16 %v1313_v34, %v1312_v7  ;;  %1749 = vmatprep.subr.bf16.mxu1 %v2980_v30 }
 0x2e5   :  { %1587 = vmatmul.mubr.bf16.gmra.mrb[20].mxu1 %v3583_v35 }
 0x2e6   :  { %v3125_v36 = vpop.eup %3124  ;;  %1750 = vmatpush1.bf16.msra.mxu1 %v2978_v53  ;;  %1769 = vmatprep.mubr.bf16.mxu1 %v3269_v0 }
 0x2e7   :  { %1751 = vmatprep.subr.bf16.mxu1 %v2983_v57  ;;  %v1314_v63 = vmul.f32 %v3125_v36, %v3552_v32  ;;  %v2995_v32 = vld [vmem:[#allocation9 + $0x134] ss:$8 sps:$4 sm:$0xff]  }
 0x2e8   :  { %v3127_v58 = vpop.eup %3126 }
 0x2e9   :  { %v1315_v19 = vmul.f32 %v3127_v58, %v3556_v39  ;;  %v2993_v39 = vld [vmem:[#allocation9 + $0x130] ss:$8 sps:$4 sm:$0xff]  }
 0x2ea   :  { %1752 = vmatpush1.bf16.msra.mxu1 %v2981_v37 }
 0x2eb   :  { %1979 = vmatprep.subr.bf16.mxu1 %v2986_v56  ;;  %v3589_v42 = vpack.c.bf16 %v1315_v19, %v1314_v63 }
 0x2ed   :  { %1770 = vmatmul.mubr.bf16.vlgmr.msra.gmra.mrb[24].mxu1 %v3516_v33 }
 0x2ee   :  { %1980 = vmatpush1.bf16.msra.mxu1 %v2984_v8  ;;  %1779 = vmatprep.mubr.bf16.mxu1 %v3269_v0 }
 0x2ef   :  { %1981 = vmatprep.subr.bf16.mxu1 %v2989_v10 }
 0x2f2   :  { %1982 = vmatpush1.bf16.msra.mxu1 %v2987_v43 }
 0x2f3   :  { %1983 = vmatprep.subr.bf16.mxu1 %v2992_v38 }
 0x2f5   :  { %1780 = vmatmul.mubr.bf16.gmra.mrb[28].mxu1 %v3530_v20 }
 0x2f6   :  { %1789 = vmatprep.mubr.bf16.mxu1 %v3269_v0  ;;  %1984 = vmatpush1.bf16.msra.mxu1 %v2990_v13 }
 0x2f7   :  { %1985 = vmatprep.subr.bf16.mxu1 %v2995_v32 }
 0x2fa   :  { %1986 = vmatpush1.bf16.msra.mxu1 %v2993_v39 }
 0x2fb   :  { %1987 = vmatprep.subr.bf16.mxu1 %v2998_v46 }
 0x2fd   :  { %1790 = vmatmul.mubr.bf16.gmra.mrb[32].mxu1 %v3544_v11 }
 0x2fe   :  { %1799 = vmatprep.mubr.bf16.mxu1 %v3269_v0  ;;  %1988 = vmatpush1.bf16.msra.mxu1 %v2996_v47 }
 0x2ff   :  { %1989 = vmatprep.subr.bf16.mxu1 %v3001_v17 }
 0x302   :  { %1990 = vmatpush1.bf16.msra.mxu1 %v2999_v16 }
 0x303   :  { %1991 = vmatprep.subr.bf16.mxu1 %v3004_v28 }
 0x305   :  { %1800 = vmatmul.mubr.bf16.gmra.mrb[36].mxu1 %v3559_v9 }
 0x306   :  { %1809 = vmatprep.mubr.bf16.mxu1 %v3269_v0  ;;  %1992 = vmatpush1.bf16.msra.mxu1 %v3002_v40 }
 0x307   :  { %1993 = vmatprep.subr.bf16.mxu1 %v3007_v49 }
 0x30a   :  { %1994 = vmatpush1.bf16.msra.mxu1 %v3005_v51 }
 0x30b   :  { %2221 = vmatprep.subr.bf16.mxu1 %v3010_v54 }
 0x30d   :  { %1810 = vmatmul.mubr.bf16.gmra.mrb[8].mxu1 %v3567_v59 }
 0x30e   :  { %1819 = vmatprep.mubr.bf16.mxu1 %v3269_v0 }
 0x315   :  { %1820 = vmatmul.mubr.bf16.gmra.mrb[12].mxu1 %v3575_v22 }
 0x316   :  { %1829 = vmatprep.mubr.bf16.mxu1 %v3269_v0 }
 0x31d   :  { %1830 = vmatmul.mubr.bf16.gmra.mrb[16].mxu1 %v3583_v35 }
 0x31e   :  { %1839 = vmatprep.mubr.bf16.mxu1 %v3269_v0 }
 0x325   :  { %1840 = vmatmul.mubr.bf16.gmra.mrb[20].mxu1 %v3589_v42 }
 0x326   :  { %2011 = vmatprep.mubr.bf16.mxu1 %v3269_v0 }
 0x32d   :  { %2012 = vmatmul.mubr.bf16.vlgmr.msra.gmra.mrb[24].mxu1 %v3516_v33  ;;  %v3020_v33 = vld [vmem:[#allocation9 + $0x1c0] ss:$8 sps:$4 sm:$0xff]  }
 0x32e   :  { %2222 = vmatpush1.bf16.msra.mxu1 %v3008_v55  ;;  %2021 = vmatprep.mubr.bf16.mxu1 %v3269_v0 }
 0x32f   :  { %2223 = vmatprep.subr.bf16.mxu1 %v3013_v60 }
 0x332   :  { %2224 = vmatpush1.bf16.msra.mxu1 %v3011_v61 }
 0x333   :  { %2225 = vmatprep.subr.bf16.mxu1 %v3016_v26 }
 0x335   :  { %2022 = vmatmul.mubr.bf16.gmra.mrb[28].mxu1 %v3530_v20 }
 0x336   :  { %2031 = vmatprep.mubr.bf16.mxu1 %v3269_v0  ;;  %2226 = vmatpush1.bf16.msra.mxu1 %v3014_v62 }
 0x337   :  { %2227 = vmatprep.subr.bf16.mxu1 %v3019_v44 }
 0x33a   :  { %2228 = vmatpush1.bf16.msra.mxu1 %v3017_v1 }
 0x33b   :  { %2229 = vmatprep.subr.bf16.mxu1 %v3022_v3 }
 0x33d   :  { %2032 = vmatmul.mubr.bf16.gmra.mrb[32].mxu1 %v3544_v11 }
 0x33e   :  { %2041 = vmatprep.mubr.bf16.mxu1 %v3269_v0  ;;  %2230 = vmatpush1.bf16.msra.mxu1 %v3020_v33 }
 0x33f   :  { %2231 = vmatprep.subr.bf16.mxu1 %v3025_v4 }
 0x342   :  { %2232 = vmatpush1.bf16.msra.mxu1 %v3023_v5 }
 0x343   :  { %2233 = vmatprep.subr.bf16.mxu1 %v3028_v6 }
 0x345   :  { %2042 = vmatmul.mubr.bf16.gmra.mrb[36].mxu1 %v3559_v9 }
 0x346   :  { %2051 = vmatprep.mubr.bf16.mxu1 %v3269_v0  ;;  %2234 = vmatpush1.bf16.msra.mxu1 %v3026_v12 }
 0x347   :  { %2235 = vmatprep.subr.bf16.mxu1 %v3031_v15 }
 0x34a   :  { %2236 = vmatpush1.bf16.msra.mxu1 %v3029_v41 }
 0x34d   :  { %2052 = vmatmul.mubr.bf16.gmra.mrb[8].mxu1 %v3567_v59 }
 0x34e   :  { %2061 = vmatprep.mubr.bf16.mxu1 %v3269_v0 }
 0x355   :  { %2062 = vmatmul.mubr.bf16.gmra.mrb[12].mxu1 %v3575_v22 }
 0x356   :  { %2071 = vmatprep.mubr.bf16.mxu1 %v3269_v0 }
 0x35d   :  { %2072 = vmatmul.mubr.bf16.gmra.mrb[16].mxu1 %v3583_v35 }
 0x35e   :  { %2081 = vmatprep.mubr.bf16.mxu1 %v3269_v0 }
 0x365   :  { %2082 = vmatmul.mubr.bf16.gmra.mrb[20].mxu1 %v3589_v42 }
 0x366   :  { %2253 = vmatprep.mubr.bf16.mxu1 %v3269_v0 }
 0x36d   :  { %2254 = vmatmul.mubr.bf16.vlgmr.msra.gmra.mrb[24].mxu1 %v3530_v20 }
 0x36e   :  { %2263 = vmatprep.mubr.bf16.mxu1 %v3269_v0 }
 0x375   :  { %2264 = vmatmul.mubr.bf16.gmra.mrb[28].mxu1 %v3544_v11 }
 0x376   :  { %2273 = vmatprep.mubr.bf16.mxu1 %v3269_v0 }
 0x37d   :  { %2274 = vmatmul.mubr.bf16.gmra.mrb[32].mxu1 %v3559_v9 }
 0x37e   :  { %2283 = vmatprep.mubr.bf16.mxu1 %v3269_v0 }
 0x385   :  { %2284 = vmatmul.mubr.bf16.gmra.mrb[36].mxu1 %v3567_v59 }
 0x386   :  { %2293 = vmatprep.mubr.bf16.mxu1 %v3269_v0 }
 0x388   :  { %v1528_v21 = vpop.f32.mrb[44].mxu0 }
 0x389   :  { %v1530_v23 = vpop.f32.mrb[45].mxu0 }
 0x38a   :  { %v1532_v24 = vpop.f32.mrb[46].mxu0 }
 0x38b   :  { %v1534_v25 = vpop.f32.mrb[47].mxu0 }
 0x38d   :  { %2294 = vmatmul.mubr.bf16.gmra.mrb[8].mxu1 %v3575_v22  ;;  %v1355_v22 = vld [vmem:[%s3799_s6] sm:$0x3] }
 0x38e   :  { %2303 = vmatprep.mubr.bf16.mxu1 %v3269_v0  ;;  %v3658_v30 = vrot.slane %v1355_v22, %v3402_v2  ;;  %v3661_v31 = vrot.slane %v1355_v22, %v3406_v14 }
 0x390   :  { %v1538_v20 = vpop.f32.mrb[48].mxu0  ;;  %v1608_v34 = vadd.f32 %v3658_v30, %v3597_v48  ;;  %v1609_v53 = vadd.f32 %v3661_v31, %v3599_v50  ;;  %v1613_v43 = vadd.f32 %v3661_v31, %v1530_v23  ;;  %v1614_v32 = vadd.f32 %v3658_v30, %v1532_v24 }
 0x391   :  { %v1540_v11 = vpop.f32.mrb[49].mxu0  ;;  %v1615_v47 = vadd.f32 %v3661_v31, %v1534_v25  ;;  %v1616_v51 = vadd.f32 %v3658_v30, %v1538_v20 }
 0x392   :  { %v1542_v45 = vpop.f32.mrb[50].mxu0 }
 0x393   :  { %v1544_v27 = vpop.f32.mrb[51].mxu0  ;;  %v1618_v60 = vadd.f32 %v3658_v30, %v1542_v45 }
 0x394   :  { %v1619_v44 = vadd.f32 %v3661_v31, %v1544_v27 }
 0x395   :  { %2304 = vmatmul.mubr.bf16.gmra.mrb[12].mxu1 %v3583_v35  ;;  %v1610_v35 = vadd.f32 %v3658_v30, %v3602_v18 }
 0x396   :  { %2313 = vmatprep.mubr.bf16.mxu1 %v3269_v0 }
 0x398   :  { %v3643_v9 = vpop.f32.mrb[52].mxu0 }
 0x399   :  { %v3645_v59 = vpop.f32.mrb[53].mxu0  ;;  %v1620_v24 = vadd.f32 %v3658_v30, %v3643_v9 }
 0x39a   :  { %v3647_v29 = vpop.f32.mrb[54].mxu0  ;;  %v1621_v25 = vadd.f32 %v3661_v31, %v3645_v59 }
 0x39b   :  { %v3649_v7 = vpop.f32.mrb[55].mxu0  ;;  %v1622_v45 = vadd.f32 %v3658_v30, %v3647_v29 }
 0x39d   :  { %2314 = vmatmul.mubr.bf16.gmra.mrb[16].mxu1 %v3589_v42  ;;  %v1612_v42 = vadd.f32 %v3658_v30, %v1528_v21 }
 0x39e   :  { %2323 = vmatprep.mubr.bf16.mxu1 %v3269_v0 }
 0x3a5   :  { %2324 = vmatmul.mubr.bf16.gmra.mrb[20].mxu1 %v3269_v0  ;;  %v1611_v0 = vadd.f32 %v3661_v31, %v3605_v52  ;;  %v1617_v52 = vadd.f32 %v3661_v31, %v1540_v11 }
 0x440   :  { %v2255_v57 = vpop.f32.mrb[24].mxu1 }
 0x441   :  { %v3671_v36 = vadd.f32 %v2255_v57, %v1608_v34  ;;  %v2257_v2 = vpop.f32.mrb[25].mxu1 }
 0x442   :  { %v2667_v37 = vadd.f32 %v2257_v2, %v1609_v53  ;;  %v2259_v56 = vpop.f32.mrb[26].mxu1  ;;  %v1623_v53 = vadd.f32 %v3661_v31, %v3649_v7 }
 0x443   :  { %v3673_v14 = vadd.f32 %v2259_v56, %v1610_v35  ;;  %v2261_v63 = vpop.f32.mrb[27].mxu1 }
 0x444   :  { %v2366_v58 = vsub.f32 0.0, %v2667_v37  ;;  %v2671_v19 = vadd.f32 %v2261_v63, %v1611_v0 }
 0x446   :  { %v2382_v8 = vmul.f32 1.442695, %v2366_v58  ;;  %v2367_v10 = vsub.f32 0.0, %v2671_v19 }
 0x448   :  { %3128 = vpow2.f32 %v2382_v8  ;;  %v2384_v38 = vmul.f32 1.442695, %v2367_v10  ;;  %v2265_v13 = vpop.f32.mrb[28].mxu1 }
 0x449   :  { %v3678_v39 = vadd.f32 %v2265_v13, %v1612_v42  ;;  %v2267_v46 = vpop.f32.mrb[29].mxu1 }
 0x44a   :  { %3130 = vpow2.f32 %v2384_v38  ;;  %v2675_v17 = vadd.f32 %v2267_v46, %v1613_v43  ;;  %v2269_v16 = vpop.f32.mrb[30].mxu1 }
 0x44b   :  { %v3681_v28 = vadd.f32 %v2269_v16, %v1614_v32  ;;  %v2271_v40 = vpop.f32.mrb[31].mxu1 }
 0x44c   :  { %v2368_v48 = vsub.f32 0.0, %v2675_v17  ;;  %v2679_v49 = vadd.f32 %v2271_v40, %v1615_v47 }
 0x44e   :  { %v2386_v50 = vmul.f32 1.442695, %v2368_v48  ;;  %v2369_v18 = vsub.f32 0.0, %v2679_v49 }
 0x450   :  { %3132 = vpow2.f32 %v2386_v50  ;;  %v2388_v54 = vmul.f32 1.442695, %v2369_v18  ;;  %v2275_v55 = vpop.f32.mrb[32].mxu1 }
 0x451   :  { %v3686_v61 = vadd.f32 %v2275_v55, %v1616_v51  ;;  %v2277_v26 = vpop.f32.mrb[33].mxu1 }
 0x452   :  { %v3129_v62 = vpop.eup %3128  ;;  %3134 = vpow2.f32 %v2388_v54  ;;  %v2683_v1 = vadd.f32 %v2277_v26, %v1617_v52  ;;  %v2279_v3 = vpop.f32.mrb[34].mxu1 }
 0x453   :  { %v2414_v33 = vadd.f32 1.0, %v3129_v62  ;;  %v3689_v4 = vadd.f32 %v2279_v3, %v1618_v60  ;;  %v2281_v5 = vpop.f32.mrb[35].mxu1 }
 0x454   :  { %v3131_v6 = vpop.eup %3130  ;;  %v2370_v12 = vsub.f32 0.0, %v2683_v1  ;;  %v2687_v15 = vadd.f32 %v2281_v5, %v1619_v44 }
 0x455   :  { %3136 = vrcp.f32 %v2414_v33  ;;  %v2415_v41 = vadd.f32 1.0, %v3131_v6 }
 0x456   :  { %v2390_v21 = vmul.f32 1.442695, %v2370_v12  ;;  %v2371_v23 = vsub.f32 0.0, %v2687_v15 }
 0x457   :  { %3138 = vrcp.f32 %v2415_v41 }
 0x458   :  { %3140 = vpow2.f32 %v2390_v21  ;;  %v2392_v20 = vmul.f32 1.442695, %v2371_v23  ;;  %v2285_v11 = vpop.f32.mrb[36].mxu1 }
 0x459   :  { %v3697_v27 = vadd.f32 %v2285_v11, %v1620_v24  ;;  %v2287_v22 = vpop.f32.mrb[37].mxu1 }
 0x45a   :  { %v3133_v34 = vpop.eup %3132  ;;  %3142 = vpow2.f32 %v2392_v20  ;;  %v2691_v35 = vadd.f32 %v2287_v22, %v1621_v25  ;;  %v2289_v9 = vpop.f32.mrb[38].mxu1 }
 0x45b   :  { %v2416_v0 = vadd.f32 1.0, %v3133_v34  ;;  %v3701_v57 = vadd.f32 %v2289_v9, %v1622_v45  ;;  %v2291_v59 = vpop.f32.mrb[39].mxu1 }
 0x45c   :  { %v3135_v2 = vpop.eup %3134  ;;  %v2372_v37 = vsub.f32 0.0, %v2691_v35  ;;  %v2695_v56 = vadd.f32 %v2291_v59, %v1623_v53 }
 0x45d   :  { %3144 = vrcp.f32 %v2416_v0  ;;  %v2417_v63 = vadd.f32 1.0, %v3135_v2 }
 0x45e   :  { %v2394_v29 = vmul.f32 1.442695, %v2372_v37  ;;  %v2373_v58 = vsub.f32 0.0, %v2695_v56 }
 0x45f   :  { %v3137_v19 = vpop.eup %3136  ;;  %3146 = vrcp.f32 %v2417_v63 }
 0x460   :  { %v2446_v8 = vmul.f32 %v3137_v19, %v3671_v36  ;;  %3148 = vpow2.f32 %v2394_v29  ;;  %v2396_v7 = vmul.f32 1.442695, %v2373_v58  ;;  %v3704_v10 = vpop.f32.mrb[8].mxu1 }
 0x461   :  { %v3139_v42 = vpop.eup %3138  ;;  %v2297_v43 = vpop.f32.mrb[9].mxu1 }
 0x462   :  { %v3141_v38 = vpop.eup %3140  ;;  %2462 = vst [vmem:[%s3800_s7] sm:$0xff] %v2446_v8  ;;  %v2447_v13 = vmul.f32 %v3139_v42, %v3673_v14  ;;  %3150 = vpow2.f32 %v2396_v7  ;;  %v2697_v32 = vadd.f32 %v2297_v43, %v3661_v31  ;;  %v3711_v46 = vpop.f32.mrb[10].mxu1 }
 0x463   :  { %v2418_v47 = vadd.f32 1.0, %v3141_v38  ;;  %v2301_v36 = vpop.f32.mrb[11].mxu1 }
 0x464   :  { %v3143_v17 = vpop.eup %3142  ;;  %2463 = vst [vmem:[%s3800_s7 + $0x8] sm:$0xff] %v2447_v13  ;;  %v2374_v16 = vsub.f32 0.0, %v2697_v32  ;;  %v2699_v40 = vadd.f32 %v2301_v36, %v3661_v31  ;;  %v2696_v36 = vadd.f32 %v3704_v10, %v3658_v30 }
 0x465   :  { %3152 = vrcp.f32 %v2418_v47  ;;  %v2419_v48 = vadd.f32 1.0, %v3143_v17 }
 0x466   :  { %v2398_v49 = vmul.f32 1.442695, %v2374_v16  ;;  %v2375_v50 = vsub.f32 0.0, %v2699_v40 }
 0x467   :  { %v3145_v14 = vpop.eup %3144  ;;  %3154 = vrcp.f32 %v2419_v48  ;;  %v2698_v48 = vadd.f32 %v3711_v46, %v3658_v30 }
 0x468   :  { %v2448_v18 = vmul.f32 %v3145_v14, %v3678_v39  ;;  %3156 = vpow2.f32 %v2398_v49  ;;  %v2400_v51 = vmul.f32 1.442695, %v2375_v50  ;;  %v3718_v52 = vpop.f32.mrb[12].mxu1 }
 0x469   :  { %v3147_v54 = vpop.eup %3146  ;;  %v2307_v55 = vpop.f32.mrb[13].mxu1  ;;  %v2700_v46 = vadd.f32 %v3718_v52, %v3658_v30 }
 0x46a   :  { %v3149_v60 = vpop.eup %3148  ;;  %2464 = vst [vmem:[%s3800_s7 + $0x10] sm:$0xff] %v2448_v18  ;;  %v2449_v26 = vmul.f32 %v3147_v54, %v3681_v28  ;;  %3158 = vpow2.f32 %v2400_v51  ;;  %v2701_v62 = vadd.f32 %v2307_v55, %v3661_v31  ;;  %v3725_v44 = vpop.f32.mrb[14].mxu1 }
 0x46b   :  { %v2420_v1 = vadd.f32 1.0, %v3149_v60  ;;  %v2311_v39 = vpop.f32.mrb[15].mxu1  ;;  %v2702_v60 = vadd.f32 %v3725_v44, %v3658_v30 }
 0x46c   :  { %v3151_v3 = vpop.eup %3150  ;;  %2465 = vst [vmem:[%s3800_s7 + $0x18] sm:$0xff] %v2449_v26  ;;  %v2376_v33 = vsub.f32 0.0, %v2701_v62  ;;  %v2703_v5 = vadd.f32 %v2311_v39, %v3661_v31 }
 0x46d   :  { %3160 = vrcp.f32 %v2420_v1  ;;  %v2421_v6 = vadd.f32 1.0, %v3151_v3 }
 0x46e   :  { %v2402_v12 = vmul.f32 1.442695, %v2376_v33  ;;  %v2377_v15 = vsub.f32 0.0, %v2703_v5 }
 0x46f   :  { %v3153_v28 = vpop.eup %3152  ;;  %3162 = vrcp.f32 %v2421_v6 }
 0x470   :  { %v2450_v41 = vmul.f32 %v3153_v28, %v3686_v61  ;;  %3164 = vpow2.f32 %v2402_v12  ;;  %v2404_v21 = vmul.f32 1.442695, %v2377_v15  ;;  %v3732_v23 = vpop.f32.mrb[16].mxu1 }
 0x471   :  { %v3155_v24 = vpop.eup %3154  ;;  %v2317_v25 = vpop.f32.mrb[17].mxu1  ;;  %v2704_v33 = vadd.f32 %v3732_v23, %v3658_v30 }
 0x472   :  { %v3157_v20 = vpop.eup %3156  ;;  %2466 = vst [vmem:[%s3800_s7 + $0x20] sm:$0xff] %v2450_v41  ;;  %v2451_v11 = vmul.f32 %v3155_v24, %v3689_v4  ;;  %3166 = vpow2.f32 %v2404_v21  ;;  %v2705_v45 = vadd.f32 %v2317_v25, %v3661_v31  ;;  %v3739_v22 = vpop.f32.mrb[18].mxu1 }
 0x473   :  { %v2422_v34 = vadd.f32 1.0, %v3157_v20  ;;  %v2321_v61 = vpop.f32.mrb[19].mxu1  ;;  %v2706_v6 = vadd.f32 %v3739_v22, %v3658_v30 }
 0x474   :  { %v3159_v53 = vpop.eup %3158  ;;  %2467 = vst [vmem:[%s3800_s7 + $0x28] sm:$0xff] %v2451_v11  ;;  %v2378_v35 = vsub.f32 0.0, %v2705_v45  ;;  %v2707_v9 = vadd.f32 %v2321_v61, %v3661_v31 }
 0x475   :  { %3168 = vrcp.f32 %v2422_v34  ;;  %v2423_v0 = vadd.f32 1.0, %v3159_v53 }
 0x476   :  { %v2406_v59 = vmul.f32 1.442695, %v2378_v35  ;;  %v2379_v2 = vsub.f32 0.0, %v2707_v9 }
 0x477   :  { %v3161_v4 = vpop.eup %3160  ;;  %3170 = vrcp.f32 %v2423_v0 }
 0x478   :  { %v2452_v37 = vmul.f32 %v3161_v4, %v3697_v27  ;;  %3172 = vpow2.f32 %v2406_v59  ;;  %v2408_v56 = vmul.f32 1.442695, %v2379_v2  ;;  %v2325_v63 = vpop.f32.mrb[20].mxu1 }
 0x479   :  { %v3163_v29 = vpop.eup %3162  ;;  %v2327_v58 = vpop.f32.mrb[21].mxu1  ;;  %v2708_v28 = vadd.f32 %v2325_v63, %v3658_v30 }
 0x47a   :  { %v3165_v19 = vpop.eup %3164  ;;  %2468 = vst [vmem:[%s3800_s7 + $0x30] sm:$0xff] %v2452_v37  ;;  %v2453_v8 = vmul.f32 %v3163_v29, %v3701_v57  ;;  %3174 = vpow2.f32 %v2408_v56  ;;  %v2709_v7 = vadd.f32 %v2327_v58, %v3661_v31  ;;  %v2329_v42 = vpop.f32.mrb[22].mxu1 }
 0x47b   :  { %v2424_v43 = vadd.f32 1.0, %v3165_v19  ;;  %v2331_v38 = vpop.f32.mrb[23].mxu1  ;;  %v2710_v23 = vadd.f32 %v2329_v42, %v3658_v30 }
 0x47c   :  { %v3167_v13 = vpop.eup %3166  ;;  %2469 = vst [vmem:[%s3800_s7 + $0x38] sm:$0xff] %v2453_v8  ;;  %v2380_v27 = vsub.f32 0.0, %v2709_v7  ;;  %v2711_v32 = vadd.f32 %v2331_v38, %v3661_v31 }
 0x47d   :  { %3176 = vrcp.f32 %v2424_v43  ;;  %v2425_v47 = vadd.f32 1.0, %v3167_v13 }
 0x47e   :  { %v2410_v57 = vmul.f32 1.442695, %v2380_v27  ;;  %v2381_v17 = vsub.f32 0.0, %v2711_v32 }
 0x47f   :  { %v3169_v16 = vpop.eup %3168  ;;  %3178 = vrcp.f32 %v2425_v47 }
 0x480   :  { %v2454_v40 = vmul.f32 %v3169_v16, %v2696_v36  ;;  %3180 = vpow2.f32 %v2410_v57  ;;  %v2412_v49 = vmul.f32 1.442695, %v2381_v17 }
 0x481   :  { %v3171_v50 = vpop.eup %3170 }
 0x482   :  { %v3173_v14 = vpop.eup %3172  ;;  %2470 = vst [vmem:[%s3800_s7 + $0x40] sm:$0xff] %v2454_v40  ;;  %v2455_v31 = vmul.f32 %v3171_v50, %v2698_v48  ;;  %3182 = vpow2.f32 %v2412_v49 }
 0x483   :  { %v2426_v18 = vadd.f32 1.0, %v3173_v14 }
 0x484   :  { %v3175_v10 = vpop.eup %3174  ;;  %2471 = vst [vmem:[%s3800_s7 + $0x48] sm:$0xff] %v2455_v31 }
 0x485   :  { %3184 = vrcp.f32 %v2426_v18  ;;  %v2427_v51 = vadd.f32 1.0, %v3175_v10 }
 0x487   :  { %v3177_v54 = vpop.eup %3176  ;;  %3186 = vrcp.f32 %v2427_v51 }
 0x488   :  { %v2456_v55 = vmul.f32 %v3177_v54, %v2700_v46 }
 0x489   :  { %v3179_v26 = vpop.eup %3178 }
 0x48a   :  { %v3181_v62 = vpop.eup %3180  ;;  %2472 = vst [vmem:[%s3800_s7 + $0x50] sm:$0xff] %v2456_v55  ;;  %v2457_v1 = vmul.f32 %v3179_v26, %v2702_v60 }
 0x48b   :  { %v2428_v39 = vadd.f32 1.0, %v3181_v62 }
 0x48c   :  { %v3183_v3 = vpop.eup %3182  ;;  %2473 = vst [vmem:[%s3800_s7 + $0x58] sm:$0xff] %v2457_v1 }
 0x48d   :  { %3188 = vrcp.f32 %v2428_v39  ;;  %v2429_v52 = vadd.f32 1.0, %v3183_v3 }
 0x48f   :  { %v3185_v5 = vpop.eup %3184  ;;  %3190 = vrcp.f32 %v2429_v52 }
 0x490   :  { %v2458_v44 = vmul.f32 %v3185_v5, %v2704_v33 }
 0x491   :  { %v3187_v12 = vpop.eup %3186 }
 0x492   :  { %2474 = vst [vmem:[%s3800_s7 + $0x60] sm:$0xff] %v2458_v44  ;;  %v2459_v15 = vmul.f32 %v3187_v12, %v2706_v6 }
 0x494   :  { %2475 = vst [vmem:[%s3800_s7 + $0x68] sm:$0xff] %v2459_v15 }
 0x497   :  { %v3189_v41 = vpop.eup %3188 }
 0x498   :  { %v2460_v21 = vmul.f32 %v3189_v41, %v2708_v28 }
 0x499   :  { %v3191_v24 = vpop.eup %3190 }
 0x49a   :  { %2476 = vst [vmem:[%s3800_s7 + $0x70] sm:$0xff] %v2460_v21  ;;  %v2461_v25 = vmul.f32 %v3191_v24, %v2710_v23 }
 0x49c   :  { %2477 = vst [vmem:[%s3800_s7 + $0x78] sm:$0xff] %v2461_v25 }
 0x49d   :  { %2482 = vsyncpa [#allocation6], 1 }
 0x49e   :  { %2483 = vsyncpa [#allocation8], 1 }

</bundles_post_ra>
